<compile_context>
chip_gen: v5e
topology: v5e:2x2
jax: 0.10.0
libtpu: 0.0.40
codegen_flags: <defaults>
</compile_context>

<pallas_src>
from functools import partial

import jax
import jax.numpy as jnp
from jax import lax
from jax.experimental import pallas as pl
from jax.experimental.pallas import tpu as pltpu


# ---------------------------------------------------------------------------
# Fused EBlock kernel: head conv (stride s) + 3 ResBlocks, all in VMEM
# ---------------------------------------------------------------------------
def _eblock_kernel(x_ref, w0_ref, b0_ref, rw_ref, rb_ref, o_ref, ypad_ref, *,
                   s, NB, Ho, Wo, Cout):
    # x_ref   : (NB, s, Hpp, Wp0*Cin)     row-phase-decomposed padded input,
    #                                     channels merged into the lane axis
    # w0_ref  : (5, Wp0*Cin, Wo*Cout)     head-conv banded weights (per dh)
    # b0_ref  : (1, Wo*Cout)              head bias, tiled to merged layout
    # rw_ref  : (30, (Wo+4)*Cout, Wo*Cout) resblock banded weights,
    #                                     index = (2*blk + leg)*5 + dh
    # rb_ref  : (6, 1, Wo*Cout)           resblock biases, tiled
    # o_ref   : (NB, Ho, Wo*Cout)         lane-merged output
    # ypad_ref: (NB, Ho+4, (Wo+4)*Cout)   zero-padded activation scratch
    f32 = jnp.float32
    WoC = Wo * Cout
    LO = 2 * Cout                      # interior lane offset inside ypad rows

    # Zero the padded scratch once; the border stays zero for the whole call
    # (scratch persists across grid steps) and the interior is always fully
    # rewritten before each conv reads it.
    @pl.when(pl.program_id(0) == 0)
    def _():
        ypad_ref[...] = jnp.zeros_like(ypad_ref)

    # ---- head conv (stride s) + ReLU: 5 banded matmuls per image -----------
    acc = [jnp.zeros((Ho, WoC), f32) for _ in range(NB)]
    for dh in range(5):
        rhs = w0_ref[dh]                               # (Wp0*Cin, Wo*Cout)
        p, q = dh % s, dh // s                         # stride phase / offset
        for n in range(NB):                            # same RHS for all n
            acc[n] += jnp.dot(x_ref[n, p, q:q + Ho, :], rhs,
                              preferred_element_type=f32)
    for n in range(NB):
        ypad_ref[n, 2:2 + Ho, LO:LO + WoC] = jnp.maximum(
            acc[n] + b0_ref[...], 0.0)

    # ---- 3 ResBlocks: conv -> ReLU -> conv, += residual ---------------------
    @pl.loop(0, 3)
    def _(blk):
        y_res = [ypad_ref[n, 2:2 + Ho, LO:LO + WoC] for n in range(NB)]
        for leg in range(2):                           # 2-leg body kept explicit
            base = (2 * blk + leg) * 5
            acc = [jnp.zeros((Ho, WoC), f32) for _ in range(NB)]
            for dh in range(5):
                rhs = rw_ref[base + dh]                # ((Wo+4)*Cout, Wo*Cout)
                for n in range(NB):
                    acc[n] += jnp.dot(ypad_ref[n, dh:dh + Ho, :], rhs,
                                      preferred_element_type=f32)
            b = rb_ref[2 * blk + leg]                  # (1, Wo*Cout)
            for n in range(NB):
                t = acc[n] + b
                ypad_ref[n, 2:2 + Ho, LO:LO + WoC] = (
                    jnp.maximum(t, 0.0) if leg == 0 else t + y_res[n])

    for n in range(NB):
        o_ref[n] = ypad_ref[n, 2:2 + Ho, LO:LO + WoC].astype(o_ref.dtype)


# ---------------------------------------------------------------------------
# Wrapper: padding, row-phase decomposition, banded-weight packing, pallas_call
# ---------------------------------------------------------------------------
def _band(w_row, Wo, stride, Wp):
    """Expand one kernel row (5, Ci, Co) into a block-banded matmul matrix.

    Returns B of shape (Wp*Ci, Wo*Co) with
        B[(w*stride + dw)*Ci + c, w*Co + co] = w_row[dw, c, co]
    so that for a lane-merged padded row-slab A of shape (rows, Wp*Ci),
    A @ B is this kernel row's contribution to the conv output in
    lane-merged (rows, Wo*Co) layout.
    """
    _, Ci, Co = w_row.shape
    m = jnp.zeros((Wp, Ci, Wo, Co), w_row.dtype)
    for w in range(Wo):
        m = m.at[w * stride:w * stride + 5, :, w, :].set(w_row)
    return m.reshape(Wp * Ci, Wo * Co)


def eblock_forward(x_nhwc, params, stride, batch_tile=None):
    """x_nhwc: (N, H, W, Cin) f32 -> (N, Ho, Wo, Cout) f32 (NHWC)."""
    N, H, W, Cin = x_nhwc.shape
    Cout = params["conv_w"].shape[-1]
    s = int(stride)
    Ho = (H + 4 - 5) // s + 1
    Wo = (W + 4 - 5) // s + 1
    WoC = Wo * Cout

    # Fold the whole batch into one grid step by default (the kernel is
    # grid-overhead / plumbing bound, not FLOP bound, at these shapes).
    NB = N if batch_tile is None else int(batch_tile)
    assert N % NB == 0

    # ---- input: pad, merge channels into lanes, row-phase decompose ---------
    Wp0 = max(W + 4, (Wo - 1) * s + 5)
    Hp0 = max(H + 4, (Ho - 1) * s + 5)
    Hpp = -(-Hp0 // s)
    Hp0 = Hpp * s
    xp = jnp.pad(x_nhwc, ((0, 0), (2, Hp0 - H - 2), (2, Wp0 - W - 2), (0, 0)))
    # xrp[n, p, i, w*Cin + c] = xp[n, i*s + p, w, c]
    xrp = xp.reshape(N, Hpp, s, Wp0 * Cin).transpose(0, 2, 1, 3)

    # ---- weights: banded per-kernel-row matrices, pre-tiled biases ----------
    w0b = jnp.stack([_band(params["conv_w"][dh], Wo, s, Wp0)
                     for dh in range(5)])                   # (5, Wp0*Cin, WoC)
    b0t = jnp.tile(params["conv_b"], Wo)[None, :]           # (1, WoC)
    Wp1 = Wo + 4
    rwb = jnp.stack([_band(params[f"rb{i}_w{j}"][dh], Wo, 1, Wp1)
                     for i in range(3) for j in (1, 2)
                     for dh in range(5)])                   # (30, Wp1*Cout, WoC)
    rbt = jnp.stack([jnp.tile(params[f"rb{i}_b{j}"], Wo)[None, :]
                     for i in range(3) for j in (1, 2)])    # (6, 1, WoC)

    flops = 2 * N * Ho * WoC * 5 * (Wp0 * Cin + 6 * Wp1 * Cout)
    bytes_accessed = 4 * (xrp.size + w0b.size + b0t.size + rwb.size
                          + rbt.size + N * Ho * WoC)

    kernel = partial(_eblock_kernel, s=s, NB=NB, Ho=Ho, Wo=Wo, Cout=Cout)
    out = pl.pallas_call(
        kernel,
        out_shape=jax.ShapeDtypeStruct((N, Ho, WoC), x_nhwc.dtype),
        grid=(N // NB,),
        in_specs=[
            pl.BlockSpec((NB, s, Hpp, Wp0 * Cin), lambda b: (b, 0, 0, 0)),
            pl.BlockSpec((5, Wp0 * Cin, WoC), lambda b: (0, 0, 0)),
            pl.BlockSpec((1, WoC), lambda b: (0, 0)),
            pl.BlockSpec((30, Wp1 * Cout, WoC), lambda b: (0, 0, 0)),
            pl.BlockSpec((6, 1, WoC), lambda b: (0, 0, 0)),
        ],
        out_specs=pl.BlockSpec((NB, Ho, WoC), lambda b: (b, 0, 0)),
        scratch_shapes=[pltpu.VMEM((NB, Ho + 4, Wp1 * Cout), jnp.float32)],
        compiler_params=pltpu.CompilerParams(
            dimension_semantics=("parallel",),
            vmem_limit_bytes=32 * 1024 * 1024),
        cost_estimate=pl.CostEstimate(
            flops=flops, transcendentals=0, bytes_accessed=bytes_accessed),
    )(xrp, w0b, b0t, rwb, rbt)

    return out.reshape(N, Ho, Wo, Cout)


# ---------------------------------------------------------------------------
# Pure-JAX reference (same math, XLA conv)
# ---------------------------------------------------------------------------
def _conv_ref(x, w, b, s):
    y = lax.conv_general_dilated(
        x, w, window_strides=(s, s), padding=((2, 2), (2, 2)),
        dimension_numbers=("NHWC", "HWIO", "NHWC"))
    return y + b


def eblock_ref(x_nhwc, params, stride):
    y = jnp.maximum(_conv_ref(x_nhwc, params["conv_w"], params["conv_b"],
                              stride), 0.0)
    for i in range(3):
        t = jnp.maximum(_conv_ref(y, params[f"rb{i}_w1"], params[f"rb{i}_b1"],
                                  1), 0.0)
        y = _conv_ref(t, params[f"rb{i}_w2"], params[f"rb{i}_b2"], 1) + y
    return y


# ---------------------------------------------------------------------------
# Deterministic parameter init (synthetic weights, HWIO layout)
# ---------------------------------------------------------------------------
def init_params(key, in_channels, out_channels):
    params = {}
    specs = [("conv_w", "conv_b", in_channels, out_channels)]
    for i in range(3):
        specs.append((f"rb{i}_w1", f"rb{i}_b1", out_channels, out_channels))
        specs.append((f"rb{i}_w2", f"rb{i}_b2", out_channels, out_channels))
    keys = jax.random.split(key, 2 * len(specs))
    for idx, (wname, bname, cin, cout) in enumerate(specs):
        scale = 1.0 / jnp.sqrt(25.0 * cin)
        params[wname] = scale * jax.random.normal(keys[2 * idx],
                                                  (5, 5, cin, cout), jnp.float32)
        params[bname] = 0.01 * jax.random.normal(keys[2 * idx + 1],
                                                 (cout,), jnp.float32)
    return params


if __name__ == "__main__":
    key = jax.random.PRNGKey(0)
    k_x, k_p = jax.random.split(key)

    N, Cin, H, W = 2, 4, 16, 16   # small NCHW input, as the PyTorch module sees it
    Cout, stride = 8, 2           # EBlock(in_channels=4, out_channels=8, stride=2)

    x_nchw = jax.random.normal(k_x, (N, Cin, H, W), jnp.float32)
    params = init_params(k_p, Cin, Cout)

    x_nhwc = jnp.transpose(x_nchw, (0, 2, 3, 1))   # NCHW -> NHWC for the kernel

    out_nhwc = eblock_forward(x_nhwc, params, stride)
    out_nhwc = jax.block_until_ready(out_nhwc)
    out_nchw = jnp.transpose(out_nhwc, (0, 3, 1, 2))  # back to NCHW convention

    ref_nhwc = eblock_ref(x_nhwc, params, stride)

    assert out_nchw.shape == (N, Cout, (H - 1) // stride + 1,
                              (W - 1) // stride + 1), out_nchw.shape
    assert jnp.allclose(out_nhwc, ref_nhwc, rtol=1e-2, atol=1e-2), (
        float(jnp.max(jnp.abs(out_nhwc - ref_nhwc))))

    print("KERNEL_OK")
</pallas_src>

<mosaic_0001>
module attributes {stable_mosaic.version = 11 : i64} {
  func.func @_eblock_kernel(%arg0: i32, %arg1: memref<2x2x10x80xf32, #tpu.memory_space<vmem>>, %arg2: memref<5x80x64xf32, #tpu.memory_space<vmem>>, %arg3: memref<1x64xf32, #tpu.memory_space<vmem>>, %arg4: memref<30x96x64xf32, #tpu.memory_space<vmem>>, %arg5: memref<6x1x64xf32, #tpu.memory_space<vmem>>, %arg6: memref<2x8x64xf32, #tpu.memory_space<vmem>>, %arg7: memref<2x12x96xf32, #tpu.memory_space<vmem>>) attributes {dimension_semantics = [#tpu.dimension_semantics<parallel>], iteration_bounds = array<i64: 1>, scalar_prefetch = 0 : i64, scratch_operands = 1 : i64, tpu.core_type = #tpu.core_type<tc>, window_params = [{transform_indices = @transform_0, window_bounds = array<i64: 2, 2, 10, 80>}, {pipeline_mode = #tpu.pipeline_mode<synchronous>, transform_indices = @transform_1, window_bounds = array<i64: 5, 80, 64>}, {pipeline_mode = #tpu.pipeline_mode<synchronous>, transform_indices = @transform_2, window_bounds = array<i64: 1, 64>}, {pipeline_mode = #tpu.pipeline_mode<synchronous>, transform_indices = @transform_3, window_bounds = array<i64: 30, 96, 64>}, {pipeline_mode = #tpu.pipeline_mode<synchronous>, transform_indices = @transform_4, window_bounds = array<i64: 6, 1, 64>}, {transform_indices = @transform_5, window_bounds = array<i64: 2, 8, 64>}]} {
    %c0_i32 = arith.constant 0 : i32
    %0 = arith.cmpi eq, %arg0, %c0_i32 : i32
    %1 = arith.extui %0 : i1 to i32
    %c0_i32_0 = arith.constant 0 : i32
    %2 = arith.cmpi ne, %1, %c0_i32_0 : i32
    scf.if %2 {
      %cst_87 = arith.constant 0.000000e+00 : f32
      %82 = vector.broadcast %cst_87 : f32 to vector<2x12x96xf32>
      %c0_88 = arith.constant 0 : index
      %c0_89 = arith.constant 0 : index
      %c0_90 = arith.constant 0 : index
      %83 = vector.load %arg7[%c0_88, %c0_89, %c0_90] : memref<2x12x96xf32, #tpu.memory_space<vmem>>, vector<2x12x96xf32>
      tpu.vector_store %arg7[%c0_88, %c0_89, %c0_90], %82 {strides = array<i32>} : memref<2x12x96xf32, #tpu.memory_space<vmem>>, vector<2x12x96xf32>,
    } else {
    }
    %cst = arith.constant 0.000000e+00 : f32
    %3 = vector.broadcast %cst : f32 to vector<8x64xf32>
    %cst_1 = arith.constant 0.000000e+00 : f32
    %4 = vector.broadcast %cst_1 : f32 to vector<8x64xf32>
    %c0 = arith.constant 0 : index
    %c0_2 = arith.constant 0 : index
    %c0_3 = arith.constant 0 : index
    %5 = vector.load %arg2[%c0, %c0_2, %c0_3] : memref<5x80x64xf32, #tpu.memory_space<vmem>>, vector<1x80x64xf32>
    %6 = vector.shape_cast %5 : vector<1x80x64xf32> to vector<80x64xf32>
    %c0_4 = arith.constant 0 : index
    %c0_5 = arith.constant 0 : index
    %c0_6 = arith.constant 0 : index
    %c0_7 = arith.constant 0 : index
    %7 = vector.load %arg1[%c0_4, %c0_5, %c0_6, %c0_7] : memref<2x2x10x80xf32, #tpu.memory_space<vmem>>, vector<1x1x8x80xf32>
    %8 = vector.shape_cast %7 : vector<1x1x8x80xf32> to vector<8x80xf32>
    %cst_8 = arith.constant dense<0.000000e+00> : vector<8x64xf32>
    %9 = tpu.matmul %8, %6, %cst_8 {dimension_numbers = #tpu.dot_dimension_numbers<[1], [0], [0], [1], [0, 0, 1, 1], [], []>} : vector<8x80xf32>, vector<80x64xf32>, vector<8x64xf32> -> vector<8x64xf32>
    %10 = arith.addf %3, %9 : vector<8x64xf32>
    %c1 = arith.constant 1 : index
    %c0_9 = arith.constant 0 : index
    %c0_10 = arith.constant 0 : index
    %c0_11 = arith.constant 0 : index
    %11 = vector.load %arg1[%c1, %c0_9, %c0_10, %c0_11] : memref<2x2x10x80xf32, #tpu.memory_space<vmem>>, vector<1x1x8x80xf32>
    %12 = vector.shape_cast %11 : vector<1x1x8x80xf32> to vector<8x80xf32>
    %cst_12 = arith.constant dense<0.000000e+00> : vector<8x64xf32>
    %13 = tpu.matmul %12, %6, %cst_12 {dimension_numbers = #tpu.dot_dimension_numbers<[1], [0], [0], [1], [0, 0, 1, 1], [], []>} : vector<8x80xf32>, vector<80x64xf32>, vector<8x64xf32> -> vector<8x64xf32>
    %14 = arith.addf %4, %13 : vector<8x64xf32>
    %c1_13 = arith.constant 1 : index
    %c0_14 = arith.constant 0 : index
    %c0_15 = arith.constant 0 : index
    %15 = vector.load %arg2[%c1_13, %c0_14, %c0_15] : memref<5x80x64xf32, #tpu.memory_space<vmem>>, vector<1x80x64xf32>
    %16 = vector.shape_cast %15 : vector<1x80x64xf32> to vector<80x64xf32>
    %c0_16 = arith.constant 0 : index
    %c1_17 = arith.constant 1 : index
    %c0_18 = arith.constant 0 : index
    %c0_19 = arith.constant 0 : index
    %17 = vector.load %arg1[%c0_16, %c1_17, %c0_18, %c0_19] : memref<2x2x10x80xf32, #tpu.memory_space<vmem>>, vector<1x1x8x80xf32>
    %18 = vector.shape_cast %17 : vector<1x1x8x80xf32> to vector<8x80xf32>
    %cst_20 = arith.constant dense<0.000000e+00> : vector<8x64xf32>
    %19 = tpu.matmul %18, %16, %cst_20 {dimension_numbers = #tpu.dot_dimension_numbers<[1], [0], [0], [1], [0, 0, 1, 1], [], []>} : vector<8x80xf32>, vector<80x64xf32>, vector<8x64xf32> -> vector<8x64xf32>
    %20 = arith.addf %10, %19 : vector<8x64xf32>
    %c1_21 = arith.constant 1 : index
    %c1_22 = arith.constant 1 : index
    %c0_23 = arith.constant 0 : index
    %c0_24 = arith.constant 0 : index
    %21 = vector.load %arg1[%c1_21, %c1_22, %c0_23, %c0_24] : memref<2x2x10x80xf32, #tpu.memory_space<vmem>>, vector<1x1x8x80xf32>
    %22 = vector.shape_cast %21 : vector<1x1x8x80xf32> to vector<8x80xf32>
    %cst_25 = arith.constant dense<0.000000e+00> : vector<8x64xf32>
    %23 = tpu.matmul %22, %16, %cst_25 {dimension_numbers = #tpu.dot_dimension_numbers<[1], [0], [0], [1], [0, 0, 1, 1], [], []>} : vector<8x80xf32>, vector<80x64xf32>, vector<8x64xf32> -> vector<8x64xf32>
    %24 = arith.addf %14, %23 : vector<8x64xf32>
    %c2 = arith.constant 2 : index
    %c0_26 = arith.constant 0 : index
    %c0_27 = arith.constant 0 : index
    %25 = vector.load %arg2[%c2, %c0_26, %c0_27] : memref<5x80x64xf32, #tpu.memory_space<vmem>>, vector<1x80x64xf32>
    %26 = vector.shape_cast %25 : vector<1x80x64xf32> to vector<80x64xf32>
    %c0_28 = arith.constant 0 : index
    %c0_29 = arith.constant 0 : index
    %c1_30 = arith.constant 1 : index
    %c0_31 = arith.constant 0 : index
    %27 = vector.load %arg1[%c0_28, %c0_29, %c1_30, %c0_31] : memref<2x2x10x80xf32, #tpu.memory_space<vmem>>, vector<1x1x8x80xf32>
    %28 = vector.shape_cast %27 : vector<1x1x8x80xf32> to vector<8x80xf32>
    %cst_32 = arith.constant dense<0.000000e+00> : vector<8x64xf32>
    %29 = tpu.matmul %28, %26, %cst_32 {dimension_numbers = #tpu.dot_dimension_numbers<[1], [0], [0], [1], [0, 0, 1, 1], [], []>} : vector<8x80xf32>, vector<80x64xf32>, vector<8x64xf32> -> vector<8x64xf32>
    %30 = arith.addf %20, %29 : vector<8x64xf32>
    %c1_33 = arith.constant 1 : index
    %c0_34 = arith.constant 0 : index
    %c1_35 = arith.constant 1 : index
    %c0_36 = arith.constant 0 : index
    %31 = vector.load %arg1[%c1_33, %c0_34, %c1_35, %c0_36] : memref<2x2x10x80xf32, #tpu.memory_space<vmem>>, vector<1x1x8x80xf32>
    %32 = vector.shape_cast %31 : vector<1x1x8x80xf32> to vector<8x80xf32>
    %cst_37 = arith.constant dense<0.000000e+00> : vector<8x64xf32>
    %33 = tpu.matmul %32, %26, %cst_37 {dimension_numbers = #tpu.dot_dimension_numbers<[1], [0], [0], [1], [0, 0, 1, 1], [], []>} : vector<8x80xf32>, vector<80x64xf32>, vector<8x64xf32> -> vector<8x64xf32>
    %34 = arith.addf %24, %33 : vector<8x64xf32>
    %c3 = arith.constant 3 : index
    %c0_38 = arith.constant 0 : index
    %c0_39 = arith.constant 0 : index
    %35 = vector.load %arg2[%c3, %c0_38, %c0_39] : memref<5x80x64xf32, #tpu.memory_space<vmem>>, vector<1x80x64xf32>
    %36 = vector.shape_cast %35 : vector<1x80x64xf32> to vector<80x64xf32>
    %c0_40 = arith.constant 0 : index
    %c1_41 = arith.constant 1 : index
    %c1_42 = arith.constant 1 : index
    %c0_43 = arith.constant 0 : index
    %37 = vector.load %arg1[%c0_40, %c1_41, %c1_42, %c0_43] : memref<2x2x10x80xf32, #tpu.memory_space<vmem>>, vector<1x1x8x80xf32>
    %38 = vector.shape_cast %37 : vector<1x1x8x80xf32> to vector<8x80xf32>
    %cst_44 = arith.constant dense<0.000000e+00> : vector<8x64xf32>
    %39 = tpu.matmul %38, %36, %cst_44 {dimension_numbers = #tpu.dot_dimension_numbers<[1], [0], [0], [1], [0, 0, 1, 1], [], []>} : vector<8x80xf32>, vector<80x64xf32>, vector<8x64xf32> -> vector<8x64xf32>
    %40 = arith.addf %30, %39 : vector<8x64xf32>
    %c1_45 = arith.constant 1 : index
    %c1_46 = arith.constant 1 : index
    %c1_47 = arith.constant 1 : index
    %c0_48 = arith.constant 0 : index
    %41 = vector.load %arg1[%c1_45, %c1_46, %c1_47, %c0_48] : memref<2x2x10x80xf32, #tpu.memory_space<vmem>>, vector<1x1x8x80xf32>
    %42 = vector.shape_cast %41 : vector<1x1x8x80xf32> to vector<8x80xf32>
    %cst_49 = arith.constant dense<0.000000e+00> : vector<8x64xf32>
    %43 = tpu.matmul %42, %36, %cst_49 {dimension_numbers = #tpu.dot_dimension_numbers<[1], [0], [0], [1], [0, 0, 1, 1], [], []>} : vector<8x80xf32>, vector<80x64xf32>, vector<8x64xf32> -> vector<8x64xf32>
    %44 = arith.addf %34, %43 : vector<8x64xf32>
    %c4 = arith.constant 4 : index
    %c0_50 = arith.constant 0 : index
    %c0_51 = arith.constant 0 : index
    %45 = vector.load %arg2[%c4, %c0_50, %c0_51] : memref<5x80x64xf32, #tpu.memory_space<vmem>>, vector<1x80x64xf32>
    %46 = vector.shape_cast %45 : vector<1x80x64xf32> to vector<80x64xf32>
    %c0_52 = arith.constant 0 : index
    %c0_53 = arith.constant 0 : index
    %c2_54 = arith.constant 2 : index
    %c0_55 = arith.constant 0 : index
    %47 = vector.load %arg1[%c0_52, %c0_53, %c2_54, %c0_55] : memref<2x2x10x80xf32, #tpu.memory_space<vmem>>, vector<1x1x8x80xf32>
    %48 = vector.shape_cast %47 : vector<1x1x8x80xf32> to vector<8x80xf32>
    %cst_56 = arith.constant dense<0.000000e+00> : vector<8x64xf32>
    %49 = tpu.matmul %48, %46, %cst_56 {dimension_numbers = #tpu.dot_dimension_numbers<[1], [0], [0], [1], [0, 0, 1, 1], [], []>} : vector<8x80xf32>, vector<80x64xf32>, vector<8x64xf32> -> vector<8x64xf32>
    %50 = arith.addf %40, %49 : vector<8x64xf32>
    %c1_57 = arith.constant 1 : index
    %c0_58 = arith.constant 0 : index
    %c2_59 = arith.constant 2 : index
    %c0_60 = arith.constant 0 : index
    %51 = vector.load %arg1[%c1_57, %c0_58, %c2_59, %c0_60] : memref<2x2x10x80xf32, #tpu.memory_space<vmem>>, vector<1x1x8x80xf32>
    %52 = vector.shape_cast %51 : vector<1x1x8x80xf32> to vector<8x80xf32>
    %cst_61 = arith.constant dense<0.000000e+00> : vector<8x64xf32>
    %53 = tpu.matmul %52, %46, %cst_61 {dimension_numbers = #tpu.dot_dimension_numbers<[1], [0], [0], [1], [0, 0, 1, 1], [], []>} : vector<8x80xf32>, vector<80x64xf32>, vector<8x64xf32> -> vector<8x64xf32>
    %54 = arith.addf %44, %53 : vector<8x64xf32>
    %c0_62 = arith.constant 0 : index
    %c0_63 = arith.constant 0 : index
    %55 = vector.load %arg3[%c0_62, %c0_63] : memref<1x64xf32, #tpu.memory_space<vmem>>, vector<1x64xf32>
    %56 = vector.broadcast %55 : vector<1x64xf32> to vector<8x64xf32>
    %57 = arith.addf %50, %56 : vector<8x64xf32>
    %cst_64 = arith.constant 0.000000e+00 : f32
    %58 = vector.broadcast %cst_64 : f32 to vector<8x64xf32>
    %59 = arith.maximumf %57, %58 : vector<8x64xf32>
    %c0_65 = arith.constant 0 : index
    %c2_66 = arith.constant 2 : index
    %c16 = arith.constant 16 : index
    %60 = vector.load %arg7[%c0_65, %c2_66, %c16] : memref<2x12x96xf32, #tpu.memory_space<vmem>>, vector<1x8x64xf32>
    %61 = vector.shape_cast %60 : vector<1x8x64xf32> to vector<8x64xf32>
    %62 = vector.shape_cast %59 : vector<8x64xf32> to vector<1x8x64xf32>
    tpu.vector_store %arg7[%c0_65, %c2_66, %c16], %62 {strides = array<i32>} : memref<2x12x96xf32, #tpu.memory_space<vmem>>, vector<1x8x64xf32>,
    %c0_67 = arith.constant 0 : index
    %c0_68 = arith.constant 0 : index
    %63 = vector.load %arg3[%c0_67, %c0_68] : memref<1x64xf32, #tpu.memory_space<vmem>>, vector<1x64xf32>
    %64 = vector.broadcast %63 : vector<1x64xf32> to vector<8x64xf32>
    %65 = arith.addf %54, %64 : vector<8x64xf32>
    %cst_69 = arith.constant 0.000000e+00 : f32
    %66 = vector.broadcast %cst_69 : f32 to vector<8x64xf32>
    %67 = arith.maximumf %65, %66 : vector<8x64xf32>
    %c1_70 = arith.constant 1 : index
    %c2_71 = arith.constant 2 : index
    %c16_72 = arith.constant 16 : index
    %68 = vector.load %arg7[%c1_70, %c2_71, %c16_72] : memref<2x12x96xf32, #tpu.memory_space<vmem>>, vector<1x8x64xf32>
    %69 = vector.shape_cast %68 : vector<1x8x64xf32> to vector<8x64xf32>
    %70 = vector.shape_cast %67 : vector<8x64xf32> to vector<1x8x64xf32>
    tpu.vector_store %arg7[%c1_70, %c2_71, %c16_72], %70 {strides = array<i32>} : memref<2x12x96xf32, #tpu.memory_space<vmem>>, vector<1x8x64xf32>,
    %c0_i32_73 = arith.constant 0 : i32
    %c3_i32 = arith.constant 3 : i32
    %71 = arith.addi %c0_i32_73, %c3_i32 : i32
    %c1_i32 = arith.constant 1 : i32
    scf.for %arg8 = %c0_i32_73 to %71 step %c1_i32  : i32 {
      %c1_i32_87 = arith.constant 1 : i32
      %82 = arith.muli %arg8, %c1_i32_87 : i32
      %c0_i32_88 = arith.constant 0 : i32
      %83 = arith.addi %c0_i32_88, %82 : i32
      %c0_89 = arith.constant 0 : index
      %c2_90 = arith.constant 2 : index
      %c16_91 = arith.constant 16 : index
      %84 = vector.load %arg7[%c0_89, %c2_90, %c16_91] : memref<2x12x96xf32, #tpu.memory_space<vmem>>, vector<1x8x64xf32>
      %85 = vector.shape_cast %84 : vector<1x8x64xf32> to vector<8x64xf32>
      %c1_92 = arith.constant 1 : index
      %c2_93 = arith.constant 2 : index
      %c16_94 = arith.constant 16 : index
      %86 = vector.load %arg7[%c1_92, %c2_93, %c16_94] : memref<2x12x96xf32, #tpu.memory_space<vmem>>, vector<1x8x64xf32>
      %87 = vector.shape_cast %86 : vector<1x8x64xf32> to vector<8x64xf32>
      %c2_i32 = arith.constant 2 : i32
      %88 = arith.muli %c2_i32, %83 : i32
      %c0_i32_95 = arith.constant 0 : i32
      %89 = arith.addi %88, %c0_i32_95 : i32
      %c5_i32 = arith.constant 5 : i32
      %90 = arith.muli %89, %c5_i32 : i32
      %cst_96 = arith.constant 0.000000e+00 : f32
      %91 = vector.broadcast %cst_96 : f32 to vector<8x64xf32>
      %cst_97 = arith.constant 0.000000e+00 : f32
      %92 = vector.broadcast %cst_97 : f32 to vector<8x64xf32>
      %c0_i32_98 = arith.constant 0 : i32
      %93 = arith.addi %90, %c0_i32_98 : i32
      %94 = arith.index_cast %93 : i32 to index
      %c0_99 = arith.constant 0 : index
      %c0_100 = arith.constant 0 : index
      %95 = vector.load %arg4[%94, %c0_99, %c0_100] : memref<30x96x64xf32, #tpu.memory_space<vmem>>, vector<1x96x64xf32>
      %96 = vector.shape_cast %95 : vector<1x96x64xf32> to vector<96x64xf32>
      %c0_101 = arith.constant 0 : index
      %c0_102 = arith.constant 0 : index
      %c0_103 = arith.constant 0 : index
      %97 = vector.load %arg7[%c0_101, %c0_102, %c0_103] : memref<2x12x96xf32, #tpu.memory_space<vmem>>, vector<1x8x96xf32>
      %98 = vector.shape_cast %97 : vector<1x8x96xf32> to vector<8x96xf32>
      %cst_104 = arith.constant dense<0.000000e+00> : vector<8x64xf32>
      %99 = tpu.matmul %98, %96, %cst_104 {dimension_numbers = #tpu.dot_dimension_numbers<[1], [0], [0], [1], [0, 0, 1, 1], [], []>} : vector<8x96xf32>, vector<96x64xf32>, vector<8x64xf32> -> vector<8x64xf32>
      %100 = arith.addf %91, %99 : vector<8x64xf32>
      %c1_105 = arith.constant 1 : index
      %c0_106 = arith.constant 0 : index
      %c0_107 = arith.constant 0 : index
      %101 = vector.load %arg7[%c1_105, %c0_106, %c0_107] : memref<2x12x96xf32, #tpu.memory_space<vmem>>, vector<1x8x96xf32>
      %102 = vector.shape_cast %101 : vector<1x8x96xf32> to vector<8x96xf32>
      %cst_108 = arith.constant dense<0.000000e+00> : vector<8x64xf32>
      %103 = tpu.matmul %102, %96, %cst_108 {dimension_numbers = #tpu.dot_dimension_numbers<[1], [0], [0], [1], [0, 0, 1, 1], [], []>} : vector<8x96xf32>, vector<96x64xf32>, vector<8x64xf32> -> vector<8x64xf32>
      %104 = arith.addf %92, %103 : vector<8x64xf32>
      %c1_i32_109 = arith.constant 1 : i32
      %105 = arith.addi %90, %c1_i32_109 : i32
      %106 = arith.index_cast %105 : i32 to index
      %c0_110 = arith.constant 0 : index
      %c0_111 = arith.constant 0 : index
      %107 = vector.load %arg4[%106, %c0_110, %c0_111] : memref<30x96x64xf32, #tpu.memory_space<vmem>>, vector<1x96x64xf32>
      %108 = vector.shape_cast %107 : vector<1x96x64xf32> to vector<96x64xf32>
      %c0_112 = arith.constant 0 : index
      %c1_113 = arith.constant 1 : index
      %c0_114 = arith.constant 0 : index
      %109 = vector.load %arg7[%c0_112, %c1_113, %c0_114] : memref<2x12x96xf32, #tpu.memory_space<vmem>>, vector<1x8x96xf32>
      %110 = vector.shape_cast %109 : vector<1x8x96xf32> to vector<8x96xf32>
      %cst_115 = arith.constant dense<0.000000e+00> : vector<8x64xf32>
      %111 = tpu.matmul %110, %108, %cst_115 {dimension_numbers = #tpu.dot_dimension_numbers<[1], [0], [0], [1], [0, 0, 1, 1], [], []>} : vector<8x96xf32>, vector<96x64xf32>, vector<8x64xf32> -> vector<8x64xf32>
      %112 = arith.addf %100, %111 : vector<8x64xf32>
      %c1_116 = arith.constant 1 : index
      %c1_117 = arith.constant 1 : index
      %c0_118 = arith.constant 0 : index
      %113 = vector.load %arg7[%c1_116, %c1_117, %c0_118] : memref<2x12x96xf32, #tpu.memory_space<vmem>>, vector<1x8x96xf32>
      %114 = vector.shape_cast %113 : vector<1x8x96xf32> to vector<8x96xf32>
      %cst_119 = arith.constant dense<0.000000e+00> : vector<8x64xf32>
      %115 = tpu.matmul %114, %108, %cst_119 {dimension_numbers = #tpu.dot_dimension_numbers<[1], [0], [0], [1], [0, 0, 1, 1], [], []>} : vector<8x96xf32>, vector<96x64xf32>, vector<8x64xf32> -> vector<8x64xf32>
      %116 = arith.addf %104, %115 : vector<8x64xf32>
      %c2_i32_120 = arith.constant 2 : i32
      %117 = arith.addi %90, %c2_i32_120 : i32
      %118 = arith.index_cast %117 : i32 to index
      %c0_121 = arith.constant 0 : index
      %c0_122 = arith.constant 0 : index
      %119 = vector.load %arg4[%118, %c0_121, %c0_122] : memref<30x96x64xf32, #tpu.memory_space<vmem>>, vector<1x96x64xf32>
      %120 = vector.shape_cast %119 : vector<1x96x64xf32> to vector<96x64xf32>
      %c0_123 = arith.constant 0 : index
      %c2_124 = arith.constant 2 : index
      %c0_125 = arith.constant 0 : index
      %121 = vector.load %arg7[%c0_123, %c2_124, %c0_125] : memref<2x12x96xf32, #tpu.memory_space<vmem>>, vector<1x8x96xf32>
      %122 = vector.shape_cast %121 : vector<1x8x96xf32> to vector<8x96xf32>
      %cst_126 = arith.constant dense<0.000000e+00> : vector<8x64xf32>
      %123 = tpu.matmul %122, %120, %cst_126 {dimension_numbers = #tpu.dot_dimension_numbers<[1], [0], [0], [1], [0, 0, 1, 1], [], []>} : vector<8x96xf32>, vector<96x64xf32>, vector<8x64xf32> -> vector<8x64xf32>
      %124 = arith.addf %112, %123 : vector<8x64xf32>
      %c1_127 = arith.constant 1 : index
      %c2_128 = arith.constant 2 : index
      %c0_129 = arith.constant 0 : index
      %125 = vector.load %arg7[%c1_127, %c2_128, %c0_129] : memref<2x12x96xf32, #tpu.memory_space<vmem>>, vector<1x8x96xf32>
      %126 = vector.shape_cast %125 : vector<1x8x96xf32> to vector<8x96xf32>
      %cst_130 = arith.constant dense<0.000000e+00> : vector<8x64xf32>
      %127 = tpu.matmul %126, %120, %cst_130 {dimension_numbers = #tpu.dot_dimension_numbers<[1], [0], [0], [1], [0, 0, 1, 1], [], []>} : vector<8x96xf32>, vector<96x64xf32>, vector<8x64xf32> -> vector<8x64xf32>
      %128 = arith.addf %116, %127 : vector<8x64xf32>
      %c3_i32_131 = arith.constant 3 : i32
      %129 = arith.addi %90, %c3_i32_131 : i32
      %130 = arith.index_cast %129 : i32 to index
      %c0_132 = arith.constant 0 : index
      %c0_133 = arith.constant 0 : index
      %131 = vector.load %arg4[%130, %c0_132, %c0_133] : memref<30x96x64xf32, #tpu.memory_space<vmem>>, vector<1x96x64xf32>
      %132 = vector.shape_cast %131 : vector<1x96x64xf32> to vector<96x64xf32>
      %c0_134 = arith.constant 0 : index
      %c3_135 = arith.constant 3 : index
      %c0_136 = arith.constant 0 : index
      %133 = vector.load %arg7[%c0_134, %c3_135, %c0_136] : memref<2x12x96xf32, #tpu.memory_space<vmem>>, vector<1x8x96xf32>
      %134 = vector.shape_cast %133 : vector<1x8x96xf32> to vector<8x96xf32>
      %cst_137 = arith.constant dense<0.000000e+00> : vector<8x64xf32>
      %135 = tpu.matmul %134, %132, %cst_137 {dimension_numbers = #tpu.dot_dimension_numbers<[1], [0], [0], [1], [0, 0, 1, 1], [], []>} : vector<8x96xf32>, vector<96x64xf32>, vector<8x64xf32> -> vector<8x64xf32>
      %136 = arith.addf %124, %135 : vector<8x64xf32>
      %c1_138 = arith.constant 1 : index
      %c3_139 = arith.constant 3 : index
      %c0_140 = arith.constant 0 : index
      %137 = vector.load %arg7[%c1_138, %c3_139, %c0_140] : memref<2x12x96xf32, #tpu.memory_space<vmem>>, vector<1x8x96xf32>
      %138 = vector.shape_cast %137 : vector<1x8x96xf32> to vector<8x96xf32>
      %cst_141 = arith.constant dense<0.000000e+00> : vector<8x64xf32>
      %139 = tpu.matmul %138, %132, %cst_141 {dimension_numbers = #tpu.dot_dimension_numbers<[1], [0], [0], [1], [0, 0, 1, 1], [], []>} : vector<8x96xf32>, vector<96x64xf32>, vector<8x64xf32> -> vector<8x64xf32>
      %140 = arith.addf %128, %139 : vector<8x64xf32>
      %c4_i32 = arith.constant 4 : i32
      %141 = arith.addi %90, %c4_i32 : i32
      %142 = arith.index_cast %141 : i32 to index
      %c0_142 = arith.constant 0 : index
      %c0_143 = arith.constant 0 : index
      %143 = vector.load %arg4[%142, %c0_142, %c0_143] : memref<30x96x64xf32, #tpu.memory_space<vmem>>, vector<1x96x64xf32>
      %144 = vector.shape_cast %143 : vector<1x96x64xf32> to vector<96x64xf32>
      %c0_144 = arith.constant 0 : index
      %c4_145 = arith.constant 4 : index
      %c0_146 = arith.constant 0 : index
      %145 = vector.load %arg7[%c0_144, %c4_145, %c0_146] : memref<2x12x96xf32, #tpu.memory_space<vmem>>, vector<1x8x96xf32>
      %146 = vector.shape_cast %145 : vector<1x8x96xf32> to vector<8x96xf32>
      %cst_147 = arith.constant dense<0.000000e+00> : vector<8x64xf32>
      %147 = tpu.matmul %146, %144, %cst_147 {dimension_numbers = #tpu.dot_dimension_numbers<[1], [0], [0], [1], [0, 0, 1, 1], [], []>} : vector<8x96xf32>, vector<96x64xf32>, vector<8x64xf32> -> vector<8x64xf32>
      %148 = arith.addf %136, %147 : vector<8x64xf32>
      %c1_148 = arith.constant 1 : index
      %c4_149 = arith.constant 4 : index
      %c0_150 = arith.constant 0 : index
      %149 = vector.load %arg7[%c1_148, %c4_149, %c0_150] : memref<2x12x96xf32, #tpu.memory_space<vmem>>, vector<1x8x96xf32>
      %150 = vector.shape_cast %149 : vector<1x8x96xf32> to vector<8x96xf32>
      %cst_151 = arith.constant dense<0.000000e+00> : vector<8x64xf32>
      %151 = tpu.matmul %150, %144, %cst_151 {dimension_numbers = #tpu.dot_dimension_numbers<[1], [0], [0], [1], [0, 0, 1, 1], [], []>} : vector<8x96xf32>, vector<96x64xf32>, vector<8x64xf32> -> vector<8x64xf32>
      %152 = arith.addf %140, %151 : vector<8x64xf32>
      %c2_i32_152 = arith.constant 2 : i32
      %153 = arith.muli %c2_i32_152, %83 : i32
      %c0_i32_153 = arith.constant 0 : i32
      %154 = arith.addi %153, %c0_i32_153 : i32
      %155 = arith.index_cast %154 : i32 to index
      %c0_154 = arith.constant 0 : index
      %c0_155 = arith.constant 0 : index
      %156 = vector.load %arg5[%155, %c0_154, %c0_155] : memref<6x1x64xf32, #tpu.memory_space<vmem>>, vector<1x1x64xf32>
      %157 = vector.shape_cast %156 : vector<1x1x64xf32> to vector<1x64xf32>
      %158 = vector.broadcast %157 : vector<1x64xf32> to vector<8x64xf32>
      %159 = arith.addf %148, %158 : vector<8x64xf32>
      %cst_156 = arith.constant 0.000000e+00 : f32
      %160 = vector.broadcast %cst_156 : f32 to vector<8x64xf32>
      %161 = arith.maximumf %159, %160 : vector<8x64xf32>
      %c0_157 = arith.constant 0 : index
      %c2_158 = arith.constant 2 : index
      %c16_159 = arith.constant 16 : index
      %162 = vector.load %arg7[%c0_157, %c2_158, %c16_159] : memref<2x12x96xf32, #tpu.memory_space<vmem>>, vector<1x8x64xf32>
      %163 = vector.shape_cast %162 : vector<1x8x64xf32> to vector<8x64xf32>
      %164 = vector.shape_cast %161 : vector<8x64xf32> to vector<1x8x64xf32>
      tpu.vector_store %arg7[%c0_157, %c2_158, %c16_159], %164 {strides = array<i32>} : memref<2x12x96xf32, #tpu.memory_space<vmem>>, vector<1x8x64xf32>,
      %165 = vector.broadcast %157 : vector<1x64xf32> to vector<8x64xf32>
      %166 = arith.addf %152, %165 : vector<8x64xf32>
      %cst_160 = arith.constant 0.000000e+00 : f32
      %167 = vector.broadcast %cst_160 : f32 to vector<8x64xf32>
      %168 = arith.maximumf %166, %167 : vector<8x64xf32>
      %c1_161 = arith.constant 1 : index
      %c2_162 = arith.constant 2 : index
      %c16_163 = arith.constant 16 : index
      %169 = vector.load %arg7[%c1_161, %c2_162, %c16_163] : memref<2x12x96xf32, #tpu.memory_space<vmem>>, vector<1x8x64xf32>
      %170 = vector.shape_cast %169 : vector<1x8x64xf32> to vector<8x64xf32>
      %171 = vector.shape_cast %168 : vector<8x64xf32> to vector<1x8x64xf32>
      tpu.vector_store %arg7[%c1_161, %c2_162, %c16_163], %171 {strides = array<i32>} : memref<2x12x96xf32, #tpu.memory_space<vmem>>, vector<1x8x64xf32>,
      %c2_i32_164 = arith.constant 2 : i32
      %172 = arith.muli %c2_i32_164, %83 : i32
      %c1_i32_165 = arith.constant 1 : i32
      %173 = arith.addi %172, %c1_i32_165 : i32
      %c5_i32_166 = arith.constant 5 : i32
      %174 = arith.muli %173, %c5_i32_166 : i32
      %cst_167 = arith.constant 0.000000e+00 : f32
      %175 = vector.broadcast %cst_167 : f32 to vector<8x64xf32>
      %cst_168 = arith.constant 0.000000e+00 : f32
      %176 = vector.broadcast %cst_168 : f32 to vector<8x64xf32>
      %c0_i32_169 = arith.constant 0 : i32
      %177 = arith.addi %174, %c0_i32_169 : i32
      %178 = arith.index_cast %177 : i32 to index
      %c0_170 = arith.constant 0 : index
      %c0_171 = arith.constant 0 : index
      %179 = vector.load %arg4[%178, %c0_170, %c0_171] : memref<30x96x64xf32, #tpu.memory_space<vmem>>, vector<1x96x64xf32>
      %180 = vector.shape_cast %179 : vector<1x96x64xf32> to vector<96x64xf32>
      %c0_172 = arith.constant 0 : index
      %c0_173 = arith.constant 0 : index
      %c0_174 = arith.constant 0 : index
      %181 = vector.load %arg7[%c0_172, %c0_173, %c0_174] : memref<2x12x96xf32, #tpu.memory_space<vmem>>, vector<1x8x96xf32>
      %182 = vector.shape_cast %181 : vector<1x8x96xf32> to vector<8x96xf32>
      %cst_175 = arith.constant dense<0.000000e+00> : vector<8x64xf32>
      %183 = tpu.matmul %182, %180, %cst_175 {dimension_numbers = #tpu.dot_dimension_numbers<[1], [0], [0], [1], [0, 0, 1, 1], [], []>} : vector<8x96xf32>, vector<96x64xf32>, vector<8x64xf32> -> vector<8x64xf32>
      %184 = arith.addf %175, %183 : vector<8x64xf32>
      %c1_176 = arith.constant 1 : index
      %c0_177 = arith.constant 0 : index
      %c0_178 = arith.constant 0 : index
      %185 = vector.load %arg7[%c1_176, %c0_177, %c0_178] : memref<2x12x96xf32, #tpu.memory_space<vmem>>, vector<1x8x96xf32>
      %186 = vector.shape_cast %185 : vector<1x8x96xf32> to vector<8x96xf32>
      %cst_179 = arith.constant dense<0.000000e+00> : vector<8x64xf32>
      %187 = tpu.matmul %186, %180, %cst_179 {dimension_numbers = #tpu.dot_dimension_numbers<[1], [0], [0], [1], [0, 0, 1, 1], [], []>} : vector<8x96xf32>, vector<96x64xf32>, vector<8x64xf32> -> vector<8x64xf32>
      %188 = arith.addf %176, %187 : vector<8x64xf32>
      %c1_i32_180 = arith.constant 1 : i32
      %189 = arith.addi %174, %c1_i32_180 : i32
      %190 = arith.index_cast %189 : i32 to index
      %c0_181 = arith.constant 0 : index
      %c0_182 = arith.constant 0 : index
      %191 = vector.load %arg4[%190, %c0_181, %c0_182] : memref<30x96x64xf32, #tpu.memory_space<vmem>>, vector<1x96x64xf32>
      %192 = vector.shape_cast %191 : vector<1x96x64xf32> to vector<96x64xf32>
      %c0_183 = arith.constant 0 : index
      %c1_184 = arith.constant 1 : index
      %c0_185 = arith.constant 0 : index
      %193 = vector.load %arg7[%c0_183, %c1_184, %c0_185] : memref<2x12x96xf32, #tpu.memory_space<vmem>>, vector<1x8x96xf32>
      %194 = vector.shape_cast %193 : vector<1x8x96xf32> to vector<8x96xf32>
      %cst_186 = arith.constant dense<0.000000e+00> : vector<8x64xf32>
      %195 = tpu.matmul %194, %192, %cst_186 {dimension_numbers = #tpu.dot_dimension_numbers<[1], [0], [0], [1], [0, 0, 1, 1], [], []>} : vector<8x96xf32>, vector<96x64xf32>, vector<8x64xf32> -> vector<8x64xf32>
      %196 = arith.addf %184, %195 : vector<8x64xf32>
      %c1_187 = arith.constant 1 : index
      %c1_188 = arith.constant 1 : index
      %c0_189 = arith.constant 0 : index
      %197 = vector.load %arg7[%c1_187, %c1_188, %c0_189] : memref<2x12x96xf32, #tpu.memory_space<vmem>>, vector<1x8x96xf32>
      %198 = vector.shape_cast %197 : vector<1x8x96xf32> to vector<8x96xf32>
      %cst_190 = arith.constant dense<0.000000e+00> : vector<8x64xf32>
      %199 = tpu.matmul %198, %192, %cst_190 {dimension_numbers = #tpu.dot_dimension_numbers<[1], [0], [0], [1], [0, 0, 1, 1], [], []>} : vector<8x96xf32>, vector<96x64xf32>, vector<8x64xf32> -> vector<8x64xf32>
      %200 = arith.addf %188, %199 : vector<8x64xf32>
      %c2_i32_191 = arith.constant 2 : i32
      %201 = arith.addi %174, %c2_i32_191 : i32
      %202 = arith.index_cast %201 : i32 to index
      %c0_192 = arith.constant 0 : index
      %c0_193 = arith.constant 0 : index
      %203 = vector.load %arg4[%202, %c0_192, %c0_193] : memref<30x96x64xf32, #tpu.memory_space<vmem>>, vector<1x96x64xf32>
      %204 = vector.shape_cast %203 : vector<1x96x64xf32> to vector<96x64xf32>
      %c0_194 = arith.constant 0 : index
      %c2_195 = arith.constant 2 : index
      %c0_196 = arith.constant 0 : index
      %205 = vector.load %arg7[%c0_194, %c2_195, %c0_196] : memref<2x12x96xf32, #tpu.memory_space<vmem>>, vector<1x8x96xf32>
      %206 = vector.shape_cast %205 : vector<1x8x96xf32> to vector<8x96xf32>
      %cst_197 = arith.constant dense<0.000000e+00> : vector<8x64xf32>
      %207 = tpu.matmul %206, %204, %cst_197 {dimension_numbers = #tpu.dot_dimension_numbers<[1], [0], [0], [1], [0, 0, 1, 1], [], []>} : vector<8x96xf32>, vector<96x64xf32>, vector<8x64xf32> -> vector<8x64xf32>
      %208 = arith.addf %196, %207 : vector<8x64xf32>
      %c1_198 = arith.constant 1 : index
      %c2_199 = arith.constant 2 : index
      %c0_200 = arith.constant 0 : index
      %209 = vector.load %arg7[%c1_198, %c2_199, %c0_200] : memref<2x12x96xf32, #tpu.memory_space<vmem>>, vector<1x8x96xf32>
      %210 = vector.shape_cast %209 : vector<1x8x96xf32> to vector<8x96xf32>
      %cst_201 = arith.constant dense<0.000000e+00> : vector<8x64xf32>
      %211 = tpu.matmul %210, %204, %cst_201 {dimension_numbers = #tpu.dot_dimension_numbers<[1], [0], [0], [1], [0, 0, 1, 1], [], []>} : vector<8x96xf32>, vector<96x64xf32>, vector<8x64xf32> -> vector<8x64xf32>
      %212 = arith.addf %200, %211 : vector<8x64xf32>
      %c3_i32_202 = arith.constant 3 : i32
      %213 = arith.addi %174, %c3_i32_202 : i32
      %214 = arith.index_cast %213 : i32 to index
      %c0_203 = arith.constant 0 : index
      %c0_204 = arith.constant 0 : index
      %215 = vector.load %arg4[%214, %c0_203, %c0_204] : memref<30x96x64xf32, #tpu.memory_space<vmem>>, vector<1x96x64xf32>
      %216 = vector.shape_cast %215 : vector<1x96x64xf32> to vector<96x64xf32>
      %c0_205 = arith.constant 0 : index
      %c3_206 = arith.constant 3 : index
      %c0_207 = arith.constant 0 : index
      %217 = vector.load %arg7[%c0_205, %c3_206, %c0_207] : memref<2x12x96xf32, #tpu.memory_space<vmem>>, vector<1x8x96xf32>
      %218 = vector.shape_cast %217 : vector<1x8x96xf32> to vector<8x96xf32>
      %cst_208 = arith.constant dense<0.000000e+00> : vector<8x64xf32>
      %219 = tpu.matmul %218, %216, %cst_208 {dimension_numbers = #tpu.dot_dimension_numbers<[1], [0], [0], [1], [0, 0, 1, 1], [], []>} : vector<8x96xf32>, vector<96x64xf32>, vector<8x64xf32> -> vector<8x64xf32>
      %220 = arith.addf %208, %219 : vector<8x64xf32>
      %c1_209 = arith.constant 1 : index
      %c3_210 = arith.constant 3 : index
      %c0_211 = arith.constant 0 : index
      %221 = vector.load %arg7[%c1_209, %c3_210, %c0_211] : memref<2x12x96xf32, #tpu.memory_space<vmem>>, vector<1x8x96xf32>
      %222 = vector.shape_cast %221 : vector<1x8x96xf32> to vector<8x96xf32>
      %cst_212 = arith.constant dense<0.000000e+00> : vector<8x64xf32>
      %223 = tpu.matmul %222, %216, %cst_212 {dimension_numbers = #tpu.dot_dimension_numbers<[1], [0], [0], [1], [0, 0, 1, 1], [], []>} : vector<8x96xf32>, vector<96x64xf32>, vector<8x64xf32> -> vector<8x64xf32>
      %224 = arith.addf %212, %223 : vector<8x64xf32>
      %c4_i32_213 = arith.constant 4 : i32
      %225 = arith.addi %174, %c4_i32_213 : i32
      %226 = arith.index_cast %225 : i32 to index
      %c0_214 = arith.constant 0 : index
      %c0_215 = arith.constant 0 : index
      %227 = vector.load %arg4[%226, %c0_214, %c0_215] : memref<30x96x64xf32, #tpu.memory_space<vmem>>, vector<1x96x64xf32>
      %228 = vector.shape_cast %227 : vector<1x96x64xf32> to vector<96x64xf32>
      %c0_216 = arith.constant 0 : index
      %c4_217 = arith.constant 4 : index
      %c0_218 = arith.constant 0 : index
      %229 = vector.load %arg7[%c0_216, %c4_217, %c0_218] : memref<2x12x96xf32, #tpu.memory_space<vmem>>, vector<1x8x96xf32>
      %230 = vector.shape_cast %229 : vector<1x8x96xf32> to vector<8x96xf32>
      %cst_219 = arith.constant dense<0.000000e+00> : vector<8x64xf32>
      %231 = tpu.matmul %230, %228, %cst_219 {dimension_numbers = #tpu.dot_dimension_numbers<[1], [0], [0], [1], [0, 0, 1, 1], [], []>} : vector<8x96xf32>, vector<96x64xf32>, vector<8x64xf32> -> vector<8x64xf32>
      %232 = arith.addf %220, %231 : vector<8x64xf32>
      %c1_220 = arith.constant 1 : index
      %c4_221 = arith.constant 4 : index
      %c0_222 = arith.constant 0 : index
      %233 = vector.load %arg7[%c1_220, %c4_221, %c0_222] : memref<2x12x96xf32, #tpu.memory_space<vmem>>, vector<1x8x96xf32>
      %234 = vector.shape_cast %233 : vector<1x8x96xf32> to vector<8x96xf32>
      %cst_223 = arith.constant dense<0.000000e+00> : vector<8x64xf32>
      %235 = tpu.matmul %234, %228, %cst_223 {dimension_numbers = #tpu.dot_dimension_numbers<[1], [0], [0], [1], [0, 0, 1, 1], [], []>} : vector<8x96xf32>, vector<96x64xf32>, vector<8x64xf32> -> vector<8x64xf32>
      %236 = arith.addf %224, %235 : vector<8x64xf32>
      %c2_i32_224 = arith.constant 2 : i32
      %237 = arith.muli %c2_i32_224, %83 : i32
      %c1_i32_225 = arith.constant 1 : i32
      %238 = arith.addi %237, %c1_i32_225 : i32
      %239 = arith.index_cast %238 : i32 to index
      %c0_226 = arith.constant 0 : index
      %c0_227 = arith.constant 0 : index
      %240 = vector.load %arg5[%239, %c0_226, %c0_227] : memref<6x1x64xf32, #tpu.memory_space<vmem>>, vector<1x1x64xf32>
      %241 = vector.shape_cast %240 : vector<1x1x64xf32> to vector<1x64xf32>
      %242 = vector.broadcast %241 : vector<1x64xf32> to vector<8x64xf32>
      %243 = arith.addf %232, %242 : vector<8x64xf32>
      %244 = arith.addf %243, %85 : vector<8x64xf32>
      %c0_228 = arith.constant 0 : index
      %c2_229 = arith.constant 2 : index
      %c16_230 = arith.constant 16 : index
      %245 = vector.load %arg7[%c0_228, %c2_229, %c16_230] : memref<2x12x96xf32, #tpu.memory_space<vmem>>, vector<1x8x64xf32>
      %246 = vector.shape_cast %245 : vector<1x8x64xf32> to vector<8x64xf32>
      %247 = vector.shape_cast %244 : vector<8x64xf32> to vector<1x8x64xf32>
      tpu.vector_store %arg7[%c0_228, %c2_229, %c16_230], %247 {strides = array<i32>} : memref<2x12x96xf32, #tpu.memory_space<vmem>>, vector<1x8x64xf32>,
      %248 = vector.broadcast %241 : vector<1x64xf32> to vector<8x64xf32>
      %249 = arith.addf %236, %248 : vector<8x64xf32>
      %250 = arith.addf %249, %87 : vector<8x64xf32>
      %c1_231 = arith.constant 1 : index
      %c2_232 = arith.constant 2 : index
      %c16_233 = arith.constant 16 : index
      %251 = vector.load %arg7[%c1_231, %c2_232, %c16_233] : memref<2x12x96xf32, #tpu.memory_space<vmem>>, vector<1x8x64xf32>
      %252 = vector.shape_cast %251 : vector<1x8x64xf32> to vector<8x64xf32>
      %253 = vector.shape_cast %250 : vector<8x64xf32> to vector<1x8x64xf32>
      tpu.vector_store %arg7[%c1_231, %c2_232, %c16_233], %253 {strides = array<i32>} : memref<2x12x96xf32, #tpu.memory_space<vmem>>, vector<1x8x64xf32>,
    }
    %c3_i32_74 = arith.constant 3 : i32
    %c0_75 = arith.constant 0 : index
    %c2_76 = arith.constant 2 : index
    %c16_77 = arith.constant 16 : index
    %72 = vector.load %arg7[%c0_75, %c2_76, %c16_77] : memref<2x12x96xf32, #tpu.memory_space<vmem>>, vector<1x8x64xf32>
    %73 = vector.shape_cast %72 : vector<1x8x64xf32> to vector<8x64xf32>
    %c0_78 = arith.constant 0 : index
    %c0_79 = arith.constant 0 : index
    %c0_80 = arith.constant 0 : index
    %74 = vector.load %arg6[%c0_78, %c0_79, %c0_80] : memref<2x8x64xf32, #tpu.memory_space<vmem>>, vector<1x8x64xf32>
    %75 = vector.shape_cast %74 : vector<1x8x64xf32> to vector<8x64xf32>
    %76 = vector.shape_cast %73 : vector<8x64xf32> to vector<1x8x64xf32>
    tpu.vector_store %arg6[%c0_78, %c0_79, %c0_80], %76 {strides = array<i32>} : memref<2x8x64xf32, #tpu.memory_space<vmem>>, vector<1x8x64xf32>,
    %c1_81 = arith.constant 1 : index
    %c2_82 = arith.constant 2 : index
    %c16_83 = arith.constant 16 : index
    %77 = vector.load %arg7[%c1_81, %c2_82, %c16_83] : memref<2x12x96xf32, #tpu.memory_space<vmem>>, vector<1x8x64xf32>
    %78 = vector.shape_cast %77 : vector<1x8x64xf32> to vector<8x64xf32>
    %c1_84 = arith.constant 1 : index
    %c0_85 = arith.constant 0 : index
    %c0_86 = arith.constant 0 : index
    %79 = vector.load %arg6[%c1_84, %c0_85, %c0_86] : memref<2x8x64xf32, #tpu.memory_space<vmem>>, vector<1x8x64xf32>
    %80 = vector.shape_cast %79 : vector<1x8x64xf32> to vector<8x64xf32>
    %81 = vector.shape_cast %78 : vector<8x64xf32> to vector<1x8x64xf32>
    tpu.vector_store %arg6[%c1_84, %c0_85, %c0_86], %81 {strides = array<i32>} : memref<2x8x64xf32, #tpu.memory_space<vmem>>, vector<1x8x64xf32>,
    return
  }
  func.func @transform_0(%arg0: i32) -> (i32, i32, i32, i32) {
    %c0_i32 = arith.constant 0 : i32
    %c0_i32_0 = arith.constant 0 : i32
    %c0_i32_1 = arith.constant 0 : i32
    %c0_i32_2 = arith.constant 0 : i32
    return %arg0, %c0_i32, %c0_i32_0, %c0_i32_1 : i32, i32, i32, i32
  }
  func.func @transform_1(%arg0: i32) -> (i32, i32, i32) {
    %c0_i32 = arith.constant 0 : i32
    %c0_i32_0 = arith.constant 0 : i32
    %c0_i32_1 = arith.constant 0 : i32
    %c0_i32_2 = arith.constant 0 : i32
    return %c0_i32, %c0_i32_0, %c0_i32_1 : i32, i32, i32
  }
  func.func @transform_2(%arg0: i32) -> (i32, i32) {
    %c0_i32 = arith.constant 0 : i32
    %c0_i32_0 = arith.constant 0 : i32
    %c0_i32_1 = arith.constant 0 : i32
    return %c0_i32, %c0_i32_0 : i32, i32
  }
  func.func @transform_3(%arg0: i32) -> (i32, i32, i32) {
    %c0_i32 = arith.constant 0 : i32
    %c0_i32_0 = arith.constant 0 : i32
    %c0_i32_1 = arith.constant 0 : i32
    %c0_i32_2 = arith.constant 0 : i32
    return %c0_i32, %c0_i32_0, %c0_i32_1 : i32, i32, i32
  }
  func.func @transform_4(%arg0: i32) -> (i32, i32, i32) {
    %c0_i32 = arith.constant 0 : i32
    %c0_i32_0 = arith.constant 0 : i32
    %c0_i32_1 = arith.constant 0 : i32
    %c0_i32_2 = arith.constant 0 : i32
    return %c0_i32, %c0_i32_0, %c0_i32_1 : i32, i32, i32
  }
  func.func @transform_5(%arg0: i32) -> (i32, i32, i32) {
    %c0_i32 = arith.constant 0 : i32
    %c0_i32_0 = arith.constant 0 : i32
    %c0_i32_1 = arith.constant 0 : i32
    return %arg0, %c0_i32, %c0_i32_0 : i32, i32, i32
  }
}

</mosaic_0001>

<bundles_post_ra>
// kernel: tpu_custom_call.1
= control target key start
LH: loop header
LB: loop body
LE: loop exit
PB: predicated region body
PF: predicated region fallthrough
CT: control target
= control target key end

     0   :  { %10 = vsyncpa [#allocation4], 0  ;;  %vm57_vm0 = vcmask 654336   ;;  %s1399_s15 = smov 16   ;;  %vm25_vm1 = vcmask 785408   ;;  %vm27_vm2 = vcmask 781312   ;;  %s1818_s0 = inlined_call_operand.vmem [shape: f32[2,2,10,80], index: 0, kind: input, shape index: {}]   ;;  %s1819_s1 = inlined_call_operand.vmem [shape: f32[5,80,64], index: 1, kind: input, shape index: {}]   ;;  %s1820_s2 = inlined_call_operand.vmem [shape: f32[1,64], index: 2, kind: input, shape index: {}]   ;;  %s1821_s3 = inlined_call_operand.vmem [shape: f32[30,96,64], index: 3, kind: input, shape index: {}]   ;;  %s1822_s4 = inlined_call_operand.vmem [shape: f32[6,1,64], index: 4, kind: input, shape index: {}]   ;;  %s1823_s5 = inlined_call_operand.hbm [shape: f32[2,8,64], index: 5, kind: output, shape index: {}]  }
   0x1   :  { %v1148_v0 = vld [vmem:[%s1819_s1 + $0x98] sm:$0xff]  ;;  %v40_v1 = vld [vmem:[%s1819_s1 + $0x48] sm:$0xff]  ;;  %v1147_v2 = vld [vmem:[%s1819_s1 + $0x90] sm:$0xff]  ;;  %vm345_vm3 = vcmask 654464  }
   0x2   :  { %67 = vmatpush.msra.mxu0 %v1148_v0  ;;  %90 = vmatpush.msra.mxu1 %v40_v1  ;;  %v39_v3 = vld [vmem:[%s1819_s1 + $0x40] sm:$0xff]  ;;  %v1146_v4 = vld [vmem:[%s1819_s1 + $0x88] sm:$0xff]  ;;  %v38_v5 = vld [vmem:[%s1819_s1 + $0x38] sm:$0xff] }
   0x3   :  { %115 = vmatpush.msra.mxu2 %v1148_v0  ;;  %138 = vmatpush.msra.mxu3 %v40_v1  ;;  %v1145_v6 = vld [vmem:[%s1819_s1 + $0x80] sm:$0xff]  ;;  %v37_v7 = vld [vmem:[%s1819_s1 + $0x30] sm:$0xff]  ;;  %v1144_v8 = vld [vmem:[%s1819_s1 + $0x78] sm:$0xff] }
   0x4   :  { %68 = vmatpush.msra.mxu0 %v1147_v2  ;;  %91 = vmatpush.msra.mxu1 %v39_v3  ;;  %v36_v9 = vld [vmem:[%s1819_s1 + $0x28] sm:$0xff]  ;;  %v1143_v10 = vld [vmem:[%s1819_s1 + $0x70] sm:$0xff]  ;;  %v35_v11 = vld [vmem:[%s1819_s1 + $0x20] sm:$0xff] }
   0x5   :  { %116 = vmatpush.msra.mxu2 %v1147_v2  ;;  %139 = vmatpush.msra.mxu3 %v39_v3  ;;  %v1142_v12 = vld [vmem:[%s1819_s1 + $0x68] sm:$0xff]  ;;  %v34_v13 = vld [vmem:[%s1819_s1 + $0x18] sm:$0xff]  ;;  %v1141_v14 = vld [vmem:[%s1819_s1 + $0x60] sm:$0xff] }
   0x6   :  { %69 = vmatpush.msra.mxu0 %v1146_v4  ;;  %92 = vmatpush.msra.mxu1 %v38_v5  ;;  %v33_v15 = vld [vmem:[%s1819_s1 + $0x10] sm:$0xff]  ;;  %v1140_v16 = vld [vmem:[%s1819_s1 + $0x58] sm:$0xff]  ;;  %v32_v17 = vld [vmem:[%s1819_s1 + $0x8] sm:$0xff] }
   0x7   :  { %117 = vmatpush.msra.mxu2 %v1146_v4  ;;  %140 = vmatpush.msra.mxu3 %v38_v5  ;;  %v1139_v18 = vld [vmem:[%s1819_s1 + $0x50] sm:$0xff]  ;;  %v31_v19 = vld [vmem:[%s1819_s1] sm:$0xff]  ;;  %v1164_v20 = vld [vmem:[%s1819_s1 + $0xe8] sm:$0xff] }
   0x8   :  { %70 = vmatpush.msra.mxu0 %v1145_v6  ;;  %93 = vmatpush.msra.mxu1 %v37_v7  ;;  %v1177_v21 = vld [vmem:[%s1819_s1 + $0x138] sm:$0xff]  ;;  %v1163_v22 = vld [vmem:[%s1819_s1 + $0xe0] sm:$0xff]  ;;  %v1176_v23 = vld [vmem:[%s1819_s1 + $0x130] sm:$0xff] }
   0x9   :  { %118 = vmatpush.msra.mxu2 %v1145_v6  ;;  %141 = vmatpush.msra.mxu3 %v37_v7  ;;  %v1162_v24 = vld [vmem:[%s1819_s1 + $0xd8] sm:$0xff]  ;;  %v1175_v25 = vld [vmem:[%s1819_s1 + $0x128] sm:$0xff]  ;;  %v1161_v26 = vld [vmem:[%s1819_s1 + $0xd0] sm:$0xff] }
   0xa   :  { %71 = vmatpush.msra.mxu0 %v1144_v8  ;;  %94 = vmatpush.msra.mxu1 %v36_v9  ;;  %v1174_v27 = vld [vmem:[%s1819_s1 + $0x120] sm:$0xff]  ;;  %v1160_v28 = vld [vmem:[%s1819_s1 + $0xc8] sm:$0xff]  ;;  %v1152_v29 = vld [vmem:[%s1818_s0 + $0x30] sm:$0xff] }
   0xb   :  { %119 = vmatpush.msra.mxu2 %v1144_v8  ;;  %142 = vmatpush.msra.mxu3 %v36_v9  ;;  %v1173_v30 = vld [vmem:[%s1819_s1 + $0x118] sm:$0xff]  ;;  %v1159_v31 = vld [vmem:[%s1819_s1 + $0xc0] sm:$0xff]  ;;  %v1172_v32 = vld [vmem:[%s1819_s1 + $0x110] sm:$0xff] }
   0xc   :  { %72 = vmatpush.msra.mxu0 %v1143_v10  ;;  %95 = vmatpush.msra.mxu1 %v35_v11  ;;  %v1158_v33 = vld [vmem:[%s1819_s1 + $0xb8] sm:$0xff]  ;;  %v1171_v34 = vld [vmem:[%s1819_s1 + $0x108] sm:$0xff]  ;;  %v1149_v35 = vld [vmem:[%s1818_s0 + $0x10] sm:$0xff] }
   0xd   :  { %120 = vmatpush.msra.mxu2 %v1143_v10  ;;  %143 = vmatpush.msra.mxu3 %v35_v11  ;;  %v1157_v36 = vld [vmem:[%s1819_s1 + $0xb0] sm:$0xff]  ;;  %v1170_v37 = vld [vmem:[%s1819_s1 + $0x100] sm:$0xff]  ;;  %v1156_v38 = vld [vmem:[%s1819_s1 + $0xa8] sm:$0xff] }
   0xe   :  { %73 = vmatpush.msra.mxu0 %v1142_v12  ;;  %96 = vmatpush.msra.mxu1 %v34_v13  ;;  %v1169_v39 = vld [vmem:[%s1819_s1 + $0xf8] sm:$0xff]  ;;  %v1138_v40 = vld [vmem:[%s1818_s0 + $0x20] sm:$0xff]  ;;  %v1168_v42 = vld [vmem:[%s1819_s1 + $0xf0] sm:$0xff] }
   0xf   :  { %121 = vmatpush.msra.mxu2 %v1142_v12  ;;  %144 = vmatpush.msra.mxu3 %v34_v13  ;;  %v1155_v41 = vld [vmem:[%s1819_s1 + $0xa0] sm:$0xff]  ;;  %v1178_v44 = vld [vmem:[%s1818_s0 + $0x11] sm:$0xff]  ;;  %v1191_v45 = vld [vmem:[%s1819_s1 + $0x188] sm:$0xff] }
  0x10   :  { %74 = vmatpush.msra.mxu0 %v1141_v14  ;;  %97 = vmatpush.msra.mxu1 %v33_v15  ;;  %v41_v43 = vld [vmem:[%s1818_s0] sm:$0xff]  ;;  %v1189_v48 = vld [vmem:[%s1819_s1 + $0x178] sm:$0xff]  ;;  %v1188_v49 = vld [vmem:[%s1819_s1 + $0x170] sm:$0xff] }
  0x11   :  { %122 = vmatpush.msra.mxu2 %v1141_v14  ;;  %145 = vmatpush.msra.mxu3 %v33_v15  ;;  %v163_v46 = vld [vmem:[%s1818_s0 + $0x1] sm:$0xff]  ;;  %v1180_v50 = vld [vmem:[%s1818_s0 + $0x31] sm:$0xff]  ;;  %v1362_v8 = vld [vmem:[%s1820_s2] ss:$0 sm:$0xff] }
  0x12   :  { %75 = vmatpush.msra.mxu0 %v1140_v16  ;;  %98 = vmatpush.msra.mxu1 %v32_v17  ;;  %v1190_v47 = vld [vmem:[%s1819_s1 + $0x180] sm:$0xff]  ;;  %v1187_v52 = vld [vmem:[%s1819_s1 + $0x168] sm:$0xff]  ;;  %v1185_v54 = vld [vmem:[%s1819_s1 + $0x158] sm:$0xff] }
  0x13   :  { %123 = vmatpush.msra.mxu2 %v1140_v16  ;;  %146 = vmatpush.msra.mxu3 %v32_v17  ;;  %v1166_v51 = vld [vmem:[%s1818_s0 + $0x21] sm:$0xff]  ;;  %v1184_v55 = vld [vmem:[%s1819_s1 + $0x150] sm:$0xff]  ;;  %v1361_v16 = vld [vmem:[%s1820_s2] ss:$0 sm:$0xff]  ;;  %s1637_s2 = smov 0  }
  0x14   :  { %76 = vmatpush.msra.mxu0 %v1139_v18  ;;  %99 = vmatpush.msra.mxu1 %v31_v19  ;;  %v1186_v53 = vld [vmem:[%s1819_s1 + $0x160] sm:$0xff]  ;;  %v1183_v56 = vld [vmem:[%s1819_s1 + $0x148] sm:$0xff] }
  0x15   :  { %124 = vmatpush.msra.mxu2 %v1139_v18  ;;  %147 = vmatpush.msra.mxu3 %v31_v19  ;;  %v1182_v57 = vld [vmem:[%s1819_s1 + $0x140] sm:$0xff] }
  0x16   :  { %173 = vmatpush.msrb.mxu0 %v1164_v20  ;;  %198 = vmatpush.msrb.mxu1 %v1164_v20  ;;  %v285_v58 = vld [vmem:[%s1818_s0 + $0x2] sm:$0xff]  ;;  %v1400_v20 = vmov 0.0  }
  0x17   :  { %234 = vmatpush.msrb.mxu2 %v1177_v21  ;;  %259 = vmatpush.msrb.mxu3 %v1177_v21  ;;  %v1193_v59 = vld [vmem:[%s1818_s0 + $0x22] sm:$0xff]  ;;  %26 = vst.msk [vmem:[#allocation2] sm:$0xff] %vm25_vm1, %v1400_v20 }
  0x18   :  { %174 = vmatpush.msrb.mxu0 %v1163_v22  ;;  %199 = vmatpush.msrb.mxu1 %v1163_v22  ;;  %28 = vst.msk [vmem:[#allocation2 + $0x8] sm:$0xf] %vm27_vm2, %v1400_v20 }
  0x19   :  { %235 = vmatpush.msrb.mxu2 %v1176_v23  ;;  %260 = vmatpush.msrb.mxu3 %v1176_v23  ;;  %29 = vst.msk [vmem:[#allocation2 + $0x10] sm:$0xff] %vm25_vm1, %v1400_v20 }
  0x1a   :  { %175 = vmatpush.msrb.mxu0 %v1162_v24  ;;  %200 = vmatpush.msrb.mxu1 %v1162_v24  ;;  %30 = vst.msk [vmem:[#allocation2 + $0x18] sm:$0xf] %vm27_vm2, %v1400_v20 }
  0x1b   :  { %236 = vmatpush.msrb.mxu2 %v1175_v25  ;;  %261 = vmatpush.msrb.mxu3 %v1175_v25 }
  0x1c   :  { %176 = vmatpush.msrb.mxu0 %v1161_v26  ;;  %201 = vmatpush.msrb.mxu1 %v1161_v26 }
  0x1d   :  { %237 = vmatpush.msrb.mxu2 %v1174_v27  ;;  %262 = vmatpush.msrb.mxu3 %v1174_v27 }
  0x1e   :  { %177 = vmatpush.msrb.mxu0 %v1160_v28  ;;  %1153 = vmatmul.msk.f32.vlgmr.msra.gmra.mxu2 %vm57_vm0, %v1152_v29 }
  0x1f   :  { %202 = vmatpush.msrb.mxu1 %v1160_v28  ;;  %238 = vmatpush.msrb.mxu2 %v1173_v30 }
  0x20   :  { %178 = vmatpush.msrb.mxu0 %v1159_v31  ;;  %263 = vmatpush.msrb.mxu3 %v1173_v30 }
  0x21   :  { %203 = vmatpush.msrb.mxu1 %v1159_v31  ;;  %239 = vmatpush.msrb.mxu2 %v1172_v32 }
  0x22   :  { %179 = vmatpush.msrb.mxu0 %v1158_v33  ;;  %264 = vmatpush.msrb.mxu3 %v1172_v32 }
  0x23   :  { %204 = vmatpush.msrb.mxu1 %v1158_v33  ;;  %240 = vmatpush.msrb.mxu2 %v1171_v34 }
  0x24   :  { %1150 = vmatmul.msk.f32.vlgmr.msra.gmra.mxu0 %vm57_vm0, %v1149_v35  ;;  %1154 = vmatmul.msk.f32.vlgmr.msra.gmra.mxu3 %vm57_vm0, %v1138_v40 }
  0x25   :  { %180 = vmatpush.msrb.mxu0 %v1157_v36  ;;  %205 = vmatpush.msrb.mxu1 %v1157_v36 }
  0x26   :  { %241 = vmatpush.msrb.mxu2 %v1170_v37  ;;  %1151 = vmatmul.msk.f32.vlgmr.msra.gmra.mxu1 %vm57_vm0, %v41_v43 }
  0x27   :  { %181 = vmatpush.msrb.mxu0 %v1156_v38  ;;  %206 = vmatpush.msrb.mxu1 %v1156_v38 }
  0x28   :  { %242 = vmatpush.msrb.mxu2 %v1169_v39  ;;  %265 = vmatpush.msrb.mxu3 %v1171_v34 }
  0x29   :  { %182 = vmatpush.msrb.mxu0 %v1155_v41  ;;  %207 = vmatpush.msrb.mxu1 %v1155_v41 }
  0x2a   :  { %243 = vmatpush.msrb.mxu2 %v1168_v42  ;;  %266 = vmatpush.msrb.mxu3 %v1170_v37 }
  0x2b   :  { %1179 = vmatmul.msk.f32.vlgmr.msrb.gmra.mxu2 %vm57_vm0, %v1178_v44  ;;  %295 = vmatpush.msra.mxu0 %v1191_v45 }
  0x2c   :  { %320 = vmatpush.msra.mxu1 %v1191_v45  ;;  %1165 = vmatmul.msk.f32.vlgmr.msrb.gmra.mxu0 %vm57_vm0, %v163_v46 }
  0x2d   :  { %296 = vmatpush.msra.mxu0 %v1190_v47  ;;  %267 = vmatpush.msrb.mxu3 %v1169_v39 }
  0x2e   :  { %321 = vmatpush.msra.mxu1 %v1190_v47 }
  0x2f   :  { %297 = vmatpush.msra.mxu0 %v1189_v48  ;;  %268 = vmatpush.msrb.mxu3 %v1168_v42 }
  0x30   :  { %322 = vmatpush.msra.mxu1 %v1189_v48  ;;  %1181 = vmatmul.msk.f32.vlgmr.msrb.gmra.mxu3 %vm57_vm0, %v1180_v50 }
  0x31   :  { %298 = vmatpush.msra.mxu0 %v1188_v49  ;;  %1167 = vmatmul.msk.f32.vlgmr.msrb.gmra.mxu1 %vm57_vm0, %v1166_v51 }
  0x32   :  { %323 = vmatpush.msra.mxu1 %v1188_v49 }
  0x33   :  { %299 = vmatpush.msra.mxu0 %v1187_v52 }
  0x34   :  { %324 = vmatpush.msra.mxu1 %v1187_v52 }
  0x35   :  { %300 = vmatpush.msra.mxu0 %v1186_v53 }
  0x36   :  { %325 = vmatpush.msra.mxu1 %v1186_v53 }
  0x37   :  { %301 = vmatpush.msra.mxu0 %v1185_v54 }
  0x38   :  { %326 = vmatpush.msra.mxu1 %v1185_v54 }
  0x39   :  { %302 = vmatpush.msra.mxu0 %v1184_v55 }
  0x3a   :  { %327 = vmatpush.msra.mxu1 %v1184_v55 }
  0x3b   :  { %303 = vmatpush.msra.mxu0 %v1183_v56 }
  0x3c   :  { %328 = vmatpush.msra.mxu1 %v1183_v56 }
  0x3d   :  { %304 = vmatpush.msra.mxu0 %v1182_v57 }
  0x3e   :  { %329 = vmatpush.msra.mxu1 %v1182_v57  ;;  %1192 = vmatmul.msk.f32.vlgmr.msra.gmra.mxu0 %vm57_vm0, %v285_v58 }
  0x3f   :  { %1194 = vmatmul.msk.f32.vlgmr.msra.gmra.mxu1 %vm57_vm0, %v1193_v59 }
  0xa1   :  { %v78_v60 = vpop.f32.mrf.mxu0  ;;  %v126_v62 = vpop.f32.mrf.mxu2 }
  0xa3   :  { %v101_v61 = vpop.f32.mrf.mxu1 }
  0xa4   :  { %v102_v2 = vadd.f32 %v101_v61, %v78_v60 }
  0xa7   :  { %v149_v63 = vpop.f32.mrf.mxu3 }
  0xa8   :  { %v150_v3 = vadd.f32 %v149_v63, %v126_v62 }
  0xa9   :  { %v184_v0 = vpop.f32.mrf.mxu0 }
  0xaa   :  { %v187_v5 = vadd.f32 %v184_v0, %v102_v2 }
  0xae   :  { %v209_v1 = vpop.f32.mrf.mxu1  ;;  %v245_v4 = vpop.f32.mrf.mxu2 }
  0xaf   :  { %v248_v6 = vadd.f32 %v245_v4, %v187_v5  ;;  %v212_v7 = vadd.f32 %v209_v1, %v150_v3 }
  0xb3   :  { %v270_v9 = vpop.f32.mrf.mxu3 }
  0xb4   :  { %v273_v13 = vadd.f32 %v270_v9, %v212_v7 }
  0xbb   :  { %v306_v10 = vpop.f32.mrf.mxu0 }
  0xbc   :  { %v309_v11 = vadd.f32 %v306_v10, %v248_v6  ;;  %v331_v12 = vpop.f32.mrf.mxu1 }
  0xbd   :  { %v334_v15 = vadd.f32 %v331_v12, %v273_v13 }
  0xbe   :  { %v339_v14 = vadd.f32 %v1362_v8, %v309_v11 }
  0xbf   :  { %v351_v18 = vadd.f32 %v1361_v16, %v334_v15 }
  0xc0   :  { %v340_v17 = vmax.f32 %v339_v14, 0.0 }
  0xc1   :  { %v352_v19 = vmax.f32 %v351_v18, 0.0 }
  0xc2   :  { %342 = vrot.lane.b32.xlu0 %v340_v17, %s1399_s15 }
  0xca   :  { %354 = vrot.lane.b32.xlu0 %v352_v19, %s1399_s15 }
 0x134   :  { %v343_v21 = vpop.permute.xlu0 %342 }
 0x135   :  { %346 = vst.msk [vmem:[#allocation2 + $0x2] sm:$0xff] %vm345_vm3, %v343_v21 }
 0x13c   :  { %v355_v22 = vpop.permute.xlu0 %354 }
 0x13d   :  { %358 = vst.msk [vmem:[#allocation2 + $0x12] sm:$0xff] %vm345_vm3, %v355_v22 }
 0x13e LB: > { %s1195_s16 = smul.u32 960, %s1397_s2  ;;  %v399_v2 = vld [vmem:[#allocation2 + $0x1] sm:$0xff]  ;;  %s1258_s20 = sshll.u32 %s1397_s2, 1  ;;  %s1397_s2 = sphi %s1637_s2, %s364_s2  }
 0x13f   : > { %v382_v3 = vld [vmem:[#allocation2] sm:$0xff]  ;;  %s1726_s23 = scalar_lea.vmem %s1822_s4, %s1258_s20  ;;  %s1401_s24 = smov 16  }
 0x140   : > { %s1646_s19 = scalar_lea.vmem %s1821_s3, %s1195_s16  ;;  %v572_v11 = vld [vmem:[#allocation2 + $0x3] sm:$0xff]  ;;  %s1402_s25 = smov 112  }
 0x141   : > { %v1208_v23 = vld [vmem:[%s1646_s19 + $0xb8] sm:$0xff]  ;;  %v1207_v25 = vld [vmem:[%s1646_s19 + $0xb0] sm:$0xff]  ;;  %v1206_v27 = vld [vmem:[%s1646_s19 + $0xa8] sm:$0xff]  ;;  %s364_s2 = sadd.s32 1, %s1397_s2  }
 0x142   : > { %v381_v24 = vld [vmem:[%s1646_s19 + $0x58] sm:$0xff]  ;;  %408 = vmatpush.msra.mxu0 %v1208_v23  ;;  %v380_v26 = vld [vmem:[%s1646_s19 + $0x50] sm:$0xff]  ;;  %455 = vmatpush.msra.mxu2 %v1208_v23  ;;  %v379_v28 = vld [vmem:[%s1646_s19 + $0x48] sm:$0xff]  ;;  %p361_p0 = scmp.ge.s32.totalorder %s364_s2, 3  }
 0x143   : > { %431 = vmatpush.msra.mxu1 %v381_v24  ;;  %478 = vmatpush.msra.mxu3 %v381_v24  ;;  %v1205_v29 = vld [vmem:[%s1646_s19 + $0xa0] sm:$0xff]  ;;  %v1204_v31 = vld [vmem:[%s1646_s19 + $0x98] sm:$0xff]  ;;  %v1203_v33 = vld [vmem:[%s1646_s19 + $0x90] sm:$0xff]  ;;  %s1403_s26 = smov (%p361_p0), 112   ;;  %vm1059_vm4 = vcmask (%p361_p0), 523264   ;;  %s1404_s27 = smov (%p361_p0), [#allocation3]  }
 0x144   : > { %409 = vmatpush.msra.mxu0 %v1207_v25  ;;  %456 = vmatpush.msra.mxu2 %v1207_v25  ;;  %v378_v30 = vld [vmem:[%s1646_s19 + $0x40] sm:$0xff]  ;;  %v377_v32 = vld [vmem:[%s1646_s19 + $0x38] sm:$0xff]  ;;  %v376_v34 = vld [vmem:[%s1646_s19 + $0x30] sm:$0xff]  ;;  %s1072_s28 = sshll.u32 (%p361_p0), %s1404_s27, 4  ;;  %s1074_s6 = sshll.u32 (%p361_p0), %s1823_s5, 4  ;;  %s1073_s28 = int_to_ptr.vmem [resolvable:$true] %s1072_s28  ;;  %s1075_s6 = int_to_ptr.hbm [resolvable:$true] %s1074_s6 }
 0x145   : > { %432 = vmatpush.msra.mxu1 %v380_v26  ;;  %479 = vmatpush.msra.mxu3 %v380_v26  ;;  %v1202_v35 = vld [vmem:[%s1646_s19 + $0x88] sm:$0xff]  ;;  %v1201_v37 = vld [vmem:[%s1646_s19 + $0x80] sm:$0xff]  ;;  %v1200_v39 = vld [vmem:[%s1646_s19 + $0x78] sm:$0xff]  ;;  %s1405_s7 = smov (%p361_p0), 128   ;;  %s1406_s8 = smov (%p361_p0), 8  }
 0x146   : > { %410 = vmatpush.msra.mxu0 %v1206_v27  ;;  %457 = vmatpush.msra.mxu2 %v1206_v27  ;;  %v375_v36 = vld [vmem:[%s1646_s19 + $0x28] sm:$0xff]  ;;  %v374_v38 = vld [vmem:[%s1646_s19 + $0x20] sm:$0xff]  ;;  %v373_v40 = vld [vmem:[%s1646_s19 + $0x18] sm:$0xff] }
 0x147   : > { %433 = vmatpush.msra.mxu1 %v379_v28  ;;  %480 = vmatpush.msra.mxu3 %v379_v28  ;;  %v1199_v41 = vld [vmem:[%s1646_s19 + $0x70] sm:$0xff]  ;;  %v1198_v43 = vld [vmem:[%s1646_s19 + $0x68] sm:$0xff]  ;;  %v1197_v45 = vld [vmem:[%s1646_s19 + $0x60] sm:$0xff] }
 0x148   : > { %411 = vmatpush.msra.mxu0 %v1205_v29  ;;  %458 = vmatpush.msra.mxu2 %v1205_v29  ;;  %v372_v42 = vld [vmem:[%s1646_s19 + $0x10] sm:$0xff]  ;;  %v371_v44 = vld [vmem:[%s1646_s19 + $0x8] sm:$0xff]  ;;  %v370_v46 = vld [vmem:[%s1646_s19] sm:$0xff] }
 0x149   : > { %434 = vmatpush.msra.mxu1 %v378_v30  ;;  %481 = vmatpush.msra.mxu3 %v378_v30  ;;  %v1225_v47 = vld [vmem:[%s1646_s19 + $0x118] sm:$0xff]  ;;  %v1224_v49 = vld [vmem:[%s1646_s19 + $0x110] sm:$0xff]  ;;  %v1223_v51 = vld [vmem:[%s1646_s19 + $0x108] sm:$0xff] }
 0x14a   : > { %412 = vmatpush.msra.mxu0 %v1204_v31  ;;  %459 = vmatpush.msra.mxu2 %v1204_v31  ;;  %v1240_v48 = vld [vmem:[%s1646_s19 + $0x178] sm:$0xff]  ;;  %v1239_v50 = vld [vmem:[%s1646_s19 + $0x170] sm:$0xff]  ;;  %v1238_v52 = vld [vmem:[%s1646_s19 + $0x168] sm:$0xff] }
 0x14b   : > { %435 = vmatpush.msra.mxu1 %v377_v32  ;;  %482 = vmatpush.msra.mxu3 %v377_v32  ;;  %v1222_v53 = vld [vmem:[%s1646_s19 + $0x100] sm:$0xff]  ;;  %v1221_v55 = vld [vmem:[%s1646_s19 + $0xf8] sm:$0xff]  ;;  %v1220_v58 = vld [vmem:[%s1646_s19 + $0xf0] sm:$0xff] }
 0x14c   : > { %413 = vmatpush.msra.mxu0 %v1203_v33  ;;  %460 = vmatpush.msra.mxu2 %v1203_v33  ;;  %v1237_v54 = vld [vmem:[%s1646_s19 + $0x160] sm:$0xff]  ;;  %v447_v56 = vld [vmem:[#allocation2 + $0x11] sm:$0xff]  ;;  %v1219_v60 = vld [vmem:[%s1646_s19 + $0xe8] sm:$0xff] }
 0x14d   : > { %436 = vmatpush.msra.mxu1 %v376_v34  ;;  %483 = vmatpush.msra.mxu3 %v376_v34  ;;  %v1236_v57 = vld [vmem:[%s1646_s19 + $0x158] sm:$0xff]  ;;  %v1235_v59 = vld [vmem:[%s1646_s19 + $0x150] sm:$0xff]  ;;  %v1234_v61 = vld [vmem:[%s1646_s19 + $0x148] sm:$0xff] }
 0x14e   : > { %414 = vmatpush.msra.mxu0 %v1202_v35  ;;  %461 = vmatpush.msra.mxu2 %v1202_v35  ;;  %v1218_v62 = vld [vmem:[%s1646_s19 + $0xe0] sm:$0xff]  ;;  %v1217_v0 = vld [vmem:[%s1646_s19 + $0xd8] sm:$0xff]  ;;  %v1216_v4 = vld [vmem:[%s1646_s19 + $0xd0] sm:$0xff] }
 0x14f   : > { %437 = vmatpush.msra.mxu1 %v375_v36  ;;  %484 = vmatpush.msra.mxu3 %v375_v36  ;;  %v1233_v63 = vld [vmem:[%s1646_s19 + $0x140] sm:$0xff]  ;;  %v1232_v1 = vld [vmem:[%s1646_s19 + $0x138] sm:$0xff]  ;;  %v1231_v5 = vld [vmem:[%s1646_s19 + $0x130] sm:$0xff] }
 0x150   : > { %415 = vmatpush.msra.mxu0 %v1201_v37  ;;  %462 = vmatpush.msra.mxu2 %v1201_v37  ;;  %v1215_v6 = vld [vmem:[%s1646_s19 + $0xc8] sm:$0xff]  ;;  %v1214_v8 = vld [vmem:[%s1646_s19 + $0xc0] sm:$0xff]  ;;  %v1255_v10 = vld [vmem:[%s1646_s19 + $0x1d8] sm:$0xff] }
 0x151   : > { %438 = vmatpush.msra.mxu1 %v374_v38  ;;  %485 = vmatpush.msra.mxu3 %v374_v38  ;;  %v1230_v7 = vld [vmem:[%s1646_s19 + $0x128] sm:$0xff]  ;;  %v1229_v9 = vld [vmem:[%s1646_s19 + $0x120] sm:$0xff]  ;;  %v383_v13 = vld [vmem:[#allocation2 + $0x10] sm:$0xff] }
 0x152   : > { %416 = vmatpush.msra.mxu0 %v1200_v39  ;;  %463 = vmatpush.msra.mxu2 %v1200_v39  ;;  %v1700_v12 = vld [vmem:[#allocation2 + $0x2] sm:$0xff]  ;;  %v1254_v14 = vld [vmem:[%s1646_s19 + $0x1d0] sm:$0xff]  ;;  %v1251_v18 = vld [vmem:[%s1646_s19 + $0x1b8] sm:$0xff] }
 0x153   : > { %439 = vmatpush.msra.mxu1 %v373_v40  ;;  %486 = vmatpush.msra.mxu3 %v373_v40  ;;  %v1704_v15 = vld [vmem:[#allocation2 + $0x12] sm:$0xff]  ;;  %v1253_v16 = vld [vmem:[%s1646_s19 + $0x1c8] sm:$0xff]  ;;  %v1252_v17 = vld [vmem:[%s1646_s19 + $0x1c0] sm:$0xff] }
 0x154   : > { %417 = vmatpush.msra.mxu0 %v1199_v41  ;;  %464 = vmatpush.msra.mxu2 %v1199_v41  ;;  %v1250_v19 = vld [vmem:[%s1646_s19 + $0x1b0] sm:$0xff]  ;;  %v1249_v21 = vld [vmem:[%s1646_s19 + $0x1a8] sm:$0xff]  ;;  %v1248_v22 = vld [vmem:[%s1646_s19 + $0x1a0] sm:$0xff] }
 0x155   : > { %440 = vmatpush.msra.mxu1 %v372_v42  ;;  %487 = vmatpush.msra.mxu3 %v372_v42  ;;  %v597_v20 = vld [vmem:[#allocation2 + $0x13] sm:$0xff]  ;;  %v1245_v25 = vld [vmem:[%s1646_s19 + $0x188] sm:$0xff]  ;;  %v1244_v26 = vld [vmem:[%s1646_s19 + $0x180] sm:$0xff] }
 0x156   : > { %418 = vmatpush.msra.mxu0 %v1198_v43  ;;  %465 = vmatpush.msra.mxu2 %v1198_v43  ;;  %v1247_v23 = vld [vmem:[%s1646_s19 + $0x198] sm:$0xff]  ;;  %v1246_v24 = vld [vmem:[%s1646_s19 + $0x190] sm:$0xff]  ;;  %v637_v27 = vld [vmem:[#allocation2 + $0x4] sm:$0xff] }
 0x157   : > { %441 = vmatpush.msra.mxu1 %v371_v44  ;;  %488 = vmatpush.msra.mxu3 %v371_v44  ;;  %v662_v28 = vld [vmem:[#allocation2 + $0x14] sm:$0xff]  ;;  %v1285_v35 = vld [vmem:[%s1646_s19 + $0x288] sm:$0xff]  ;;  %v1284_v38 = vld [vmem:[%s1646_s19 + $0x280] sm:$0xff] }
 0x158   : > { %419 = vmatpush.msra.mxu0 %v1197_v45  ;;  %466 = vmatpush.msra.mxu2 %v1197_v45  ;;  %v1287_v30 = vld [vmem:[%s1646_s19 + $0x298] sm:$0xff]  ;;  %v1286_v32 = vld [vmem:[%s1646_s19 + $0x290] sm:$0xff]  ;;  %v1270_v36 = vld [vmem:[%s1646_s19 + $0x228] sm:$0xff] }
 0x159   : > { %442 = vmatpush.msra.mxu1 %v370_v46  ;;  %489 = vmatpush.msra.mxu3 %v370_v46  ;;  %v1272_v31 = vld [vmem:[%s1646_s19 + $0x238] sm:$0xff]  ;;  %v1271_v34 = vld [vmem:[%s1646_s19 + $0x230] sm:$0xff]  ;;  %v1269_v39 = vld [vmem:[%s1646_s19 + $0x220] sm:$0xff] }
 0x15a   : > { %516 = vmatpush.msrb.mxu0 %v1225_v47  ;;  %580 = vmatpush.msrb.mxu2 %v1240_v48  ;;  %v1283_v40 = vld [vmem:[%s1646_s19 + $0x278] sm:$0xff]  ;;  %v1282_v43 = vld [vmem:[%s1646_s19 + $0x270] sm:$0xff] }
 0x15b   : > { %540 = vmatpush.msrb.mxu1 %v1225_v47  ;;  %605 = vmatpush.msrb.mxu3 %v1240_v48  ;;  %v1268_v41 = vld [vmem:[%s1646_s19 + $0x218] sm:$0xff]  ;;  %v1267_v44 = vld [vmem:[%s1646_s19 + $0x210] sm:$0xff]  ;;  %v1281_v48 = vld [vmem:[%s1646_s19 + $0x268] sm:$0xff] }
 0x15c   : > { %517 = vmatpush.msrb.mxu0 %v1224_v49  ;;  %581 = vmatpush.msrb.mxu2 %v1239_v50 }
 0x15d   : > { %541 = vmatpush.msrb.mxu1 %v1224_v49  ;;  %606 = vmatpush.msrb.mxu3 %v1239_v50  ;;  %v1266_v49 = vld [vmem:[%s1646_s19 + $0x208] sm:$0xff] }
 0x15e   : > { %518 = vmatpush.msrb.mxu0 %v1223_v51  ;;  %582 = vmatpush.msrb.mxu2 %v1238_v52 }
 0x15f   : > { %542 = vmatpush.msrb.mxu1 %v1223_v51  ;;  %1211 = vmatmul.msk.f32.vlgmr.msra.gmra.mxu2 %vm25_vm1, %v447_v56  ;;  %v1280_v51 = vld [vmem:[%s1646_s19 + $0x260] sm:$0xff]  ;;  %v1264_v56 = vld [vmem:[%s1646_s19 + $0x1f8] sm:$0xff] }
 0x160   : > { %519 = vmatpush.msrb.mxu0 %v1222_v53  ;;  %583 = vmatpush.msrb.mxu2 %v1237_v54 }
 0x161   : > { %543 = vmatpush.msrb.mxu1 %v1222_v53  ;;  %607 = vmatpush.msrb.mxu3 %v1238_v52  ;;  %v1265_v52 = vld [vmem:[%s1646_s19 + $0x200] sm:$0xff] }
 0x162   : > { %520 = vmatpush.msrb.mxu0 %v1221_v55  ;;  %584 = vmatpush.msrb.mxu2 %v1236_v57 }
 0x163   : > { %544 = vmatpush.msrb.mxu1 %v1221_v55  ;;  %608 = vmatpush.msrb.mxu3 %v1237_v54  ;;  %v1279_v55 = vld [vmem:[%s1646_s19 + $0x258] sm:$0xff] }
 0x164   : > { %521 = vmatpush.msrb.mxu0 %v1220_v58  ;;  %585 = vmatpush.msrb.mxu2 %v1235_v59 }
 0x165   : > { %545 = vmatpush.msrb.mxu1 %v1220_v58  ;;  %609 = vmatpush.msrb.mxu3 %v1236_v57 }
 0x166   : > { %522 = vmatpush.msrb.mxu0 %v1219_v60  ;;  %586 = vmatpush.msrb.mxu2 %v1234_v61 }
 0x167   : > { %546 = vmatpush.msrb.mxu1 %v1219_v60  ;;  %610 = vmatpush.msrb.mxu3 %v1235_v59  ;;  %v1363_v59 = vld [vmem:[%s1726_s23] ss:$0 sm:$0xff]  ;;  %v1278_v60 = vld [vmem:[%s1646_s19 + $0x250] sm:$0xff] }
 0x168   : > { %523 = vmatpush.msrb.mxu0 %v1218_v62  ;;  %587 = vmatpush.msrb.mxu2 %v1233_v63 }
 0x169   : > { %547 = vmatpush.msrb.mxu1 %v1218_v62  ;;  %1209 = vmatmul.msk.f32.vlgmr.msra.gmra.mxu0 %vm25_vm1, %v399_v2  ;;  %v1262_v2 = vld [vmem:[%s1646_s19 + $0x1e8] sm:$0xff] }
 0x16a   : > { %524 = vmatpush.msrb.mxu0 %v1217_v0  ;;  %588 = vmatpush.msrb.mxu2 %v1232_v1 }
 0x16b   : > { %548 = vmatpush.msrb.mxu1 %v1217_v0  ;;  %611 = vmatpush.msrb.mxu3 %v1234_v61  ;;  %v1263_v61 = vld [vmem:[%s1646_s19 + $0x1f0] sm:$0xff] }
 0x16c   : > { %1210 = vmatmul.msk.f32.vlgmr.msra.gmra.mxu1 %vm25_vm1, %v382_v3  ;;  %525 = vmatpush.msrb.mxu0 %v1216_v4 }
 0x16d   : > { %549 = vmatpush.msrb.mxu1 %v1216_v4  ;;  %589 = vmatpush.msrb.mxu2 %v1231_v5 }
 0x16e   : > { %526 = vmatpush.msrb.mxu0 %v1215_v6  ;;  %612 = vmatpush.msrb.mxu3 %v1233_v63 }
 0x16f   : > { %550 = vmatpush.msrb.mxu1 %v1215_v6  ;;  %590 = vmatpush.msrb.mxu2 %v1230_v7  ;;  %v1276_v6 = vld [vmem:[%s1646_s19 + $0x240] sm:$0xff] }
 0x170   : > { %527 = vmatpush.msrb.mxu0 %v1214_v8  ;;  %1212 = vmatmul.msk.f32.vlgmr.msra.gmra.mxu3 %vm25_vm1, %v383_v13  ;;  %v1304_v13 = vld [vmem:[%s1646_s19 + $0x2e8] sm:$0xff] }
 0x171   : > { %551 = vmatpush.msrb.mxu1 %v1214_v8  ;;  %591 = vmatpush.msrb.mxu2 %v1229_v9  ;;  %v1306_v8 = vld [vmem:[%s1646_s19 + $0x2f8] sm:$0xff] }
 0x172   : > { %645 = vmatpush.msra.mxu0 %v1255_v10  ;;  %1241 = vmatmul.msk.f32.vlgmr.msrb.gmra.mxu2 %vm25_vm1, %v572_v11  ;;  %v1305_v11 = vld [vmem:[%s1646_s19 + $0x2f0] sm:$0xff] }
 0x173   : > { %670 = vmatpush.msra.mxu1 %v1255_v10  ;;  %1226 = vmatmul.msk.f32.vlgmr.msrb.gmra.mxu0 %vm25_vm1, %v1700_v12 }
 0x174   : > { %646 = vmatpush.msra.mxu0 %v1254_v14  ;;  %613 = vmatpush.msrb.mxu3 %v1232_v1  ;;  %v1277_v1 = vld [vmem:[%s1646_s19 + $0x248] sm:$0xff] }
 0x175   : > { %671 = vmatpush.msra.mxu1 %v1254_v14  ;;  %748 = vmatpush.msra.mxu2 %v1287_v30 }
 0x176   : > { %1227 = vmatmul.msk.f32.vlgmr.msrb.gmra.mxu1 %vm25_vm1, %v1704_v15  ;;  %647 = vmatpush.msra.mxu0 %v1253_v16 }
 0x177   : > { %672 = vmatpush.msra.mxu1 %v1253_v16  ;;  %614 = vmatpush.msrb.mxu3 %v1231_v5  ;;  %v1303_v16 = vld [vmem:[%s1646_s19 + $0x2e0] sm:$0xff] }
 0x178   : > { %648 = vmatpush.msra.mxu0 %v1252_v17  ;;  %749 = vmatpush.msra.mxu2 %v1286_v32 }
 0x179   : > { %673 = vmatpush.msra.mxu1 %v1252_v17  ;;  %615 = vmatpush.msrb.mxu3 %v1230_v7  ;;  %v1261_v7 = vld [vmem:[%s1646_s19 + $0x1e0] sm:$0xff]  ;;  %v1302_v17 = vld [vmem:[%s1646_s19 + $0x2d8] sm:$0xff] }
 0x17a   : > { %649 = vmatpush.msra.mxu0 %v1251_v18  ;;  %750 = vmatpush.msra.mxu2 %v1285_v35 }
 0x17b   : > { %674 = vmatpush.msra.mxu1 %v1251_v18  ;;  %616 = vmatpush.msrb.mxu3 %v1229_v9 }
 0x17c   : > { %650 = vmatpush.msra.mxu0 %v1250_v19  ;;  %1242 = vmatmul.msk.f32.vlgmr.msrb.gmra.mxu3 %vm25_vm1, %v597_v20  ;;  %v1300_v20 = vld [vmem:[%s1646_s19 + $0x2c8] sm:$0xff] }
 0x17d   : > { %675 = vmatpush.msra.mxu1 %v1250_v19  ;;  %771 = vmatpush.msra.mxu3 %v1272_v31  ;;  %v1301_v19 = vld [vmem:[%s1646_s19 + $0x2d0] sm:$0xff] }
 0x17e   : > { %651 = vmatpush.msra.mxu0 %v1249_v21  ;;  %751 = vmatpush.msra.mxu2 %v1284_v38 }
 0x17f   : > { %676 = vmatpush.msra.mxu1 %v1249_v21  ;;  %772 = vmatpush.msra.mxu3 %v1271_v34  ;;  %v1299_v21 = vld [vmem:[%s1646_s19 + $0x2c0] sm:$0xff] }
 0x180   : > { %652 = vmatpush.msra.mxu0 %v1248_v22  ;;  %752 = vmatpush.msra.mxu2 %v1283_v40 }
 0x181   : > { %677 = vmatpush.msra.mxu1 %v1248_v22  ;;  %773 = vmatpush.msra.mxu3 %v1270_v36  ;;  %v1298_v22 = vld [vmem:[%s1646_s19 + $0x2b8] sm:$0xff] }
 0x182   : > { %653 = vmatpush.msra.mxu0 %v1247_v23  ;;  %753 = vmatpush.msra.mxu2 %v1282_v43 }
 0x183   : > { %678 = vmatpush.msra.mxu1 %v1247_v23  ;;  %774 = vmatpush.msra.mxu3 %v1269_v39  ;;  %v1323_v23 = vld [vmem:[%s1646_s19 + $0x358] sm:$0xff] }
 0x184   : > { %654 = vmatpush.msra.mxu0 %v1246_v24  ;;  %754 = vmatpush.msra.mxu2 %v1281_v48 }
 0x185   : > { %679 = vmatpush.msra.mxu1 %v1246_v24  ;;  %775 = vmatpush.msra.mxu3 %v1268_v41  ;;  %v1297_v24 = vld [vmem:[%s1646_s19 + $0x2b0] sm:$0xff] }
 0x186   : > { %655 = vmatpush.msra.mxu0 %v1245_v25  ;;  %755 = vmatpush.msra.mxu2 %v1280_v51 }
 0x187   : > { %680 = vmatpush.msra.mxu1 %v1245_v25  ;;  %776 = vmatpush.msra.mxu3 %v1267_v44  ;;  %v1322_v25 = vld [vmem:[%s1646_s19 + $0x350] sm:$0xff] }
 0x188   : > { %656 = vmatpush.msra.mxu0 %v1244_v26  ;;  %756 = vmatpush.msra.mxu2 %v1279_v55 }
 0x189   : > { %681 = vmatpush.msra.mxu1 %v1244_v26  ;;  %1256 = vmatmul.msk.f32.vlgmr.msra.gmra.mxu0 %vm25_vm1, %v637_v27  ;;  %v1296_v26 = vld [vmem:[%s1646_s19 + $0x2a8] sm:$0xff] }
 0x18a   : > { %1257 = vmatmul.msk.f32.vlgmr.msra.gmra.mxu1 %vm25_vm1, %v662_v28  ;;  %795 = vmatpush.msrb.mxu0 %v1287_v30  ;;  %v1321_v27 = vld [vmem:[%s1646_s19 + $0x348] sm:$0xff]  ;;  %v1319_v28 = vld [vmem:[%s1646_s19 + $0x338] sm:$0xff] }
 0x18b   : > { %818 = vmatpush.msrb.mxu1 %v1272_v31  ;;  %777 = vmatpush.msra.mxu3 %v1266_v49  ;;  %v1317_v30 = vld [vmem:[%s1646_s19 + $0x328] sm:$0xff]  ;;  %v1316_v31 = vld [vmem:[%s1646_s19 + $0x320] sm:$0xff] }
 0x18c   : > { %796 = vmatpush.msrb.mxu0 %v1286_v32  ;;  %757 = vmatpush.msra.mxu2 %v1278_v60  ;;  %v1315_v32 = vld [vmem:[%s1646_s19 + $0x318] sm:$0xff] }
 0x18d   : > { %819 = vmatpush.msrb.mxu1 %v1271_v34  ;;  %778 = vmatpush.msra.mxu3 %v1265_v52  ;;  %v1313_v34 = vld [vmem:[%s1646_s19 + $0x308] sm:$0xff] }
 0x18e   : > { %797 = vmatpush.msrb.mxu0 %v1285_v35  ;;  %758 = vmatpush.msra.mxu2 %v1277_v1  ;;  %v1312_v35 = vld [vmem:[%s1646_s19 + $0x300] sm:$0xff] }
 0x18f   : > { %820 = vmatpush.msrb.mxu1 %v1270_v36  ;;  %779 = vmatpush.msra.mxu3 %v1264_v56 }
 0x190   : > { %798 = vmatpush.msrb.mxu0 %v1284_v38  ;;  %759 = vmatpush.msra.mxu2 %v1276_v6 }
 0x191   : > { %821 = vmatpush.msrb.mxu1 %v1269_v39  ;;  %780 = vmatpush.msra.mxu3 %v1263_v61 }
 0x192   : > { %799 = vmatpush.msrb.mxu0 %v1283_v40  ;;  %857 = vmatpush.msrb.mxu2 %v1306_v8 }
 0x193   : > { %822 = vmatpush.msrb.mxu1 %v1268_v41  ;;  %781 = vmatpush.msra.mxu3 %v1262_v2  ;;  %v1339_v41 = vld [vmem:[%s1646_s19 + $0x3b0] sm:$0xff] }
 0x194   : > { %800 = vmatpush.msrb.mxu0 %v1282_v43  ;;  %858 = vmatpush.msrb.mxu2 %v1305_v11  ;;  %v1337_v43 = vld [vmem:[%s1646_s19 + $0x3a0] sm:$0xff] }
 0x195   : > { %823 = vmatpush.msrb.mxu1 %v1267_v44  ;;  %782 = vmatpush.msra.mxu3 %v1261_v7  ;;  %v1336_v44 = vld [vmem:[%s1646_s19 + $0x398] sm:$0xff] }
 0x196   : > { %801 = vmatpush.msrb.mxu0 %v1281_v48  ;;  %859 = vmatpush.msrb.mxu2 %v1304_v13 }
 0x197   : > { %824 = vmatpush.msrb.mxu1 %v1266_v49  ;;  %882 = vmatpush.msrb.mxu3 %v1306_v8  ;;  %v1335_v49 = vld [vmem:[%s1646_s19 + $0x390] sm:$0xff] }
 0x198   : > { %802 = vmatpush.msrb.mxu0 %v1280_v51  ;;  %860 = vmatpush.msrb.mxu2 %v1303_v16  ;;  %v1333_v51 = vld [vmem:[%s1646_s19 + $0x380] sm:$0xff] }
 0x199   : > { %825 = vmatpush.msrb.mxu1 %v1265_v52  ;;  %883 = vmatpush.msrb.mxu3 %v1305_v11  ;;  %v1332_v52 = vld [vmem:[%s1646_s19 + $0x378] sm:$0xff] }
 0x19a   : > { %803 = vmatpush.msrb.mxu0 %v1279_v55  ;;  %861 = vmatpush.msrb.mxu2 %v1302_v17  ;;  %v1331_v55 = vld [vmem:[%s1646_s19 + $0x370] sm:$0xff] }
 0x19b   : > { %826 = vmatpush.msrb.mxu1 %v1264_v56  ;;  %884 = vmatpush.msrb.mxu3 %v1304_v13  ;;  %v1330_v56 = vld [vmem:[%s1646_s19 + $0x368] sm:$0xff] }
 0x19c   : > { %804 = vmatpush.msrb.mxu0 %v1278_v60  ;;  %862 = vmatpush.msrb.mxu2 %v1301_v19 }
 0x19d   : > { %827 = vmatpush.msrb.mxu1 %v1263_v61  ;;  %885 = vmatpush.msrb.mxu3 %v1303_v16 }
 0x19e   : > { %805 = vmatpush.msrb.mxu0 %v1277_v1  ;;  %863 = vmatpush.msrb.mxu2 %v1300_v20 }
 0x19f   : > { %828 = vmatpush.msrb.mxu1 %v1262_v2  ;;  %886 = vmatpush.msrb.mxu3 %v1302_v17 }
 0x1a0   : > { %806 = vmatpush.msrb.mxu0 %v1276_v6  ;;  %864 = vmatpush.msrb.mxu2 %v1299_v21 }
 0x1a1   : > { %829 = vmatpush.msrb.mxu1 %v1261_v7  ;;  %887 = vmatpush.msrb.mxu3 %v1301_v19 }
 0x1a2   : > { %1035 = vrot.lane.b32.xlu1 %v1700_v12, %s1402_s25  ;;  %865 = vmatpush.msrb.mxu2 %v1298_v22  ;;  %v1295_v12 = vld [vmem:[%s1646_s19 + $0x2a0] sm:$0xff] }
 0x1a3   : > { %888 = vmatpush.msrb.mxu3 %v1300_v20  ;;  %922 = vmatpush.msra.mxu0 %v1323_v23 }
 0x1a4   : > { %947 = vmatpush.msra.mxu1 %v1323_v23  ;;  %866 = vmatpush.msrb.mxu2 %v1297_v24 }
 0x1a5   : > { %889 = vmatpush.msrb.mxu3 %v1299_v21  ;;  %923 = vmatpush.msra.mxu0 %v1322_v25 }
 0x1a6   : > { %948 = vmatpush.msra.mxu1 %v1322_v25  ;;  %867 = vmatpush.msrb.mxu2 %v1296_v26 }
 0x1a7   : > { %890 = vmatpush.msrb.mxu3 %v1298_v22  ;;  %924 = vmatpush.msra.mxu0 %v1321_v27 }
 0x1a8   : > { %949 = vmatpush.msra.mxu1 %v1321_v27  ;;  %868 = vmatpush.msrb.mxu2 %v1295_v12 }
 0x1a9   : > { %891 = vmatpush.msrb.mxu3 %v1297_v24 }
 0x1aa   : > { %1045 = vrot.lane.b32.xlu1 %v1704_v15, %s1402_s25  ;;  %v1320_v15 = vld [vmem:[%s1646_s19 + $0x340] sm:$0xff] }
 0x1ab   : > { %892 = vmatpush.msrb.mxu3 %v1296_v26  ;;  %925 = vmatpush.msra.mxu0 %v1320_v15 }
 0x1ac   : > { %950 = vmatpush.msra.mxu1 %v1320_v15 }
 0x1ad   : > { %893 = vmatpush.msrb.mxu3 %v1295_v12  ;;  %926 = vmatpush.msra.mxu0 %v1319_v28 }
 0x1ae   : > { %951 = vmatpush.msra.mxu1 %v1319_v28 }
 0x1e2   : > { %v468_v37 = vpop.f32.mrf.mxu2 }
 0x1e6   : > { %v421_v29 = vpop.f32.mrf.mxu0 }
 0x1e9   : > { %v444_v33 = vpop.f32.mrf.mxu1 }
 0x1ea   : > { %v445_v47 = vadd.f32 %v444_v33, %v421_v29  ;;  %v1318_v29 = vld [vmem:[%s1646_s19 + $0x330] sm:$0xff] }
 0x1eb   : > { %927 = vmatpush.msra.mxu0 %v1318_v29  ;;  %952 = vmatpush.msra.mxu1 %v1318_v29  ;;  %v1314_v33 = vld [vmem:[%s1646_s19 + $0x310] sm:$0xff] }
 0x1ed   : > { %928 = vmatpush.msra.mxu0 %v1317_v30  ;;  %953 = vmatpush.msra.mxu1 %v1317_v30 }
 0x1ef   : > { %929 = vmatpush.msra.mxu0 %v1316_v31  ;;  %954 = vmatpush.msra.mxu1 %v1316_v31 }
 0x1f0   : > { %v529_v45 = vpop.f32.mrf.mxu0 }
 0x1f1   : > { %v532_v54 = vadd.f32 %v529_v45, %v445_v47  ;;  %930 = vmatpush.msra.mxu0 %v1315_v32  ;;  %955 = vmatpush.msra.mxu1 %v1315_v32 }
 0x1f3   : > { %v491_v42 = vpop.f32.mrf.mxu3  ;;  %v553_v46 = vpop.f32.mrf.mxu1  ;;  %931 = vmatpush.msra.mxu0 %v1314_v33  ;;  %956 = vmatpush.msra.mxu1 %v1314_v33 }
 0x1f4   : > { %v492_v50 = vadd.f32 %v491_v42, %v468_v37  ;;  %v1340_v37 = vld [vmem:[%s1646_s19 + $0x3b8] sm:$0xff]  ;;  %v1338_v42 = vld [vmem:[%s1646_s19 + $0x3a8] sm:$0xff] }
 0x1f5   : > { %v593_v53 = vpop.f32.mrf.mxu2  ;;  %932 = vmatpush.msra.mxu0 %v1313_v34  ;;  %957 = vmatpush.msra.mxu1 %v1313_v34 }
 0x1f6   : > { %v596_v57 = vadd.f32 %v593_v53, %v532_v54  ;;  %v556_v58 = vadd.f32 %v553_v46, %v492_v50  ;;  %v1334_v50 = vld [vmem:[%s1646_s19 + $0x388] sm:$0xff] }
 0x1f7   : > { %933 = vmatpush.msra.mxu0 %v1312_v35  ;;  %958 = vmatpush.msra.mxu1 %v1312_v35 }
 0x1ff   : > { %v618_v62 = vpop.f32.mrf.mxu3 }
 0x200   : > { %v621_v4 = vadd.f32 %v618_v62, %v556_v58 }
 0x206   : > { %v658_v63 = vpop.f32.mrf.mxu0 }
 0x207   : > { %v661_v0 = vadd.f32 %v658_v63, %v596_v57  ;;  %v683_v3 = vpop.f32.mrf.mxu1  ;;  %v1329_v57 = vld [vmem:[%s1646_s19 + $0x360] sm:$0xff] }
 0x208   : > { %v686_v9 = vadd.f32 %v683_v3, %v621_v4 }
 0x209   : > { %v693_v5 = vadd.f32 %v1363_v59, %v661_v0 }
 0x20a   : > { %v700_v14 = vadd.f32 %v1363_v59, %v686_v9  ;;  %v1364_v9 = vld [vmem:[%s1726_s23 + $0x1] ss:$0 sm:$0xff] }
 0x20b   : > { %v694_v10 = vmax.f32 %v693_v5, 0.0 }
 0x20c   : > { %v701_v18 = vmax.f32 %v700_v14, 0.0 }
 0x20d   : > { %696 = vrot.lane.b32.xlu0 %v694_v10, %s1401_s24 }
 0x214   : > { %v1036_v8 = vpop.permute.xlu1 %1035 }
 0x215   : > { %703 = vrot.lane.b32.xlu0 %v701_v18, %s1401_s24 }
 0x21c   : > { %v1046_v21 = vpop.permute.xlu1 %1045 }
 0x27f   : > { %v697_v36 = vpop.permute.xlu0 %696 }
 0x280   : > { %699 = vst.msk [vmem:[#allocation2 + $0x2] sm:$0xff] %vm345_vm3, %v697_v36 }
 0x287   : > { %v704_v38 = vpop.permute.xlu0 %703  ;;  %v740_v39 = vld [vmem:[#allocation2 + $0x1] sm:$0xff] }
 0x288   : > { %v723_v40 = vld [vmem:[#allocation2] sm:$0xff]  ;;  %706 = vst.msk [vmem:[#allocation2 + $0x12] sm:$0xff] %vm345_vm3, %v704_v38  ;;  %1288 = vmatmul.msk.f32.vlgmr.msra.gmra.mxu2 %vm25_vm1, %v740_v39 }
 0x289   : > { %1289 = vmatmul.msk.f32.vlgmr.msra.gmra.mxu3 %vm25_vm1, %v723_v40  ;;  %987 = vmatpush.msra.mxu2 %v1340_v37  ;;  %v849_v48 = vld [vmem:[#allocation2 + $0x2] sm:$0xff] }
 0x28a   : > { %1012 = vmatpush.msra.mxu3 %v1340_v37  ;;  %v914_v53 = vld [vmem:[#allocation2 + $0x3] sm:$0xff] }
 0x28b   : > { %988 = vmatpush.msra.mxu2 %v1339_v41  ;;  %v979_v58 = vld [vmem:[#allocation2 + $0x4] sm:$0xff] }
 0x28c   : > { %1013 = vmatpush.msra.mxu3 %v1339_v41 }
 0x28d   : > { %989 = vmatpush.msra.mxu2 %v1338_v42 }
 0x28e   : > { %1014 = vmatpush.msra.mxu3 %v1338_v42 }
 0x28f   : > { %990 = vmatpush.msra.mxu2 %v1337_v43  ;;  %v787_v45 = vld [vmem:[#allocation2 + $0x11] sm:$0xff] }
 0x290   : > { %1015 = vmatpush.msra.mxu3 %v1337_v43  ;;  %v724_v46 = vld [vmem:[#allocation2 + $0x10] sm:$0xff]  ;;  %1290 = vmatmul.msk.f32.vlgmr.msrb.gmra.mxu0 %vm25_vm1, %v787_v45 }
 0x291   : > { %v874_v47 = vld [vmem:[#allocation2 + $0x12] sm:$0xff]  ;;  %1291 = vmatmul.msk.f32.vlgmr.msrb.gmra.mxu1 %vm25_vm1, %v724_v46  ;;  %1307 = vmatmul.msk.f32.vlgmr.msrb.gmra.mxu2 %vm25_vm1, %v849_v48 }
 0x292   : > { %1308 = vmatmul.msk.f32.vlgmr.msrb.gmra.mxu3 %vm25_vm1, %v874_v47  ;;  %991 = vmatpush.msra.mxu2 %v1336_v44  ;;  %v939_v54 = vld [vmem:[#allocation2 + $0x13] sm:$0xff] }
 0x293   : > { %1016 = vmatpush.msra.mxu3 %v1336_v44  ;;  %v1004_v59 = vld [vmem:[#allocation2 + $0x14] sm:$0xff] }
 0x294   : > { %992 = vmatpush.msra.mxu2 %v1335_v49 }
 0x295   : > { %1017 = vmatpush.msra.mxu3 %v1335_v49 }
 0x296   : > { %993 = vmatpush.msra.mxu2 %v1334_v50 }
 0x297   : > { %1018 = vmatpush.msra.mxu3 %v1334_v50 }
 0x298   : > { %994 = vmatpush.msra.mxu2 %v1333_v51  ;;  %1324 = vmatmul.msk.f32.vlgmr.msra.gmra.mxu0 %vm25_vm1, %v914_v53 }
 0x299   : > { %1019 = vmatpush.msra.mxu3 %v1333_v51  ;;  %1325 = vmatmul.msk.f32.vlgmr.msra.gmra.mxu1 %vm25_vm1, %v939_v54 }
 0x29a   : > { %995 = vmatpush.msra.mxu2 %v1332_v52 }
 0x29b   : > { %1020 = vmatpush.msra.mxu3 %v1332_v52 }
 0x29c   : > { %996 = vmatpush.msra.mxu2 %v1331_v55 }
 0x29d   : > { %1021 = vmatpush.msra.mxu3 %v1331_v55 }
 0x29e   : > { %997 = vmatpush.msra.mxu2 %v1330_v56 }
 0x29f   : > { %1022 = vmatpush.msra.mxu3 %v1330_v56 }
 0x2a0   : > { %998 = vmatpush.msra.mxu2 %v1329_v57 }
 0x2a1   : > { %1023 = vmatpush.msra.mxu3 %v1329_v57  ;;  %1341 = vmatmul.msk.f32.vlgmr.msra.gmra.mxu2 %vm25_vm1, %v979_v58 }
 0x2a2   : > { %1342 = vmatmul.msk.f32.vlgmr.msra.gmra.mxu3 %vm25_vm1, %v1004_v59 }
 0x30b   : > { %v761_v60 = vpop.f32.mrf.mxu2 }
 0x30c   : > { %v784_v61 = vpop.f32.mrf.mxu3 }
 0x30d   : > { %v808_v62 = vpop.f32.mrf.mxu0  ;;  %v785_v1 = vadd.f32 %v784_v61, %v761_v60 }
 0x30e   : > { %v831_v63 = vpop.f32.mrf.mxu1 }
 0x30f   : > { %v832_v5 = vadd.f32 %v831_v63, %v808_v62 }
 0x314   : > { %v870_v0 = vpop.f32.mrf.mxu2 }
 0x315   : > { %v895_v2 = vpop.f32.mrf.mxu3  ;;  %v873_v3 = vadd.f32 %v870_v0, %v785_v1  ;;  %v935_v4 = vpop.f32.mrf.mxu0 }
 0x316   : > { %v898_v6 = vadd.f32 %v895_v2, %v832_v5  ;;  %v960_v10 = vpop.f32.mrf.mxu1 }
 0x317   : > { %v938_v7 = vadd.f32 %v935_v4, %v873_v3 }
 0x318   : > { %v963_v16 = vadd.f32 %v960_v10, %v898_v6 }
 0x324   : > { %v1000_v11 = vpop.f32.mrf.mxu2 }
 0x325   : > { %v1003_v13 = vadd.f32 %v1000_v11, %v938_v7  ;;  %v1025_v14 = vpop.f32.mrf.mxu3 }
 0x326   : > { %v1028_v18 = vadd.f32 %v1025_v14, %v963_v16 }
 0x327   : > { %v1034_v17 = vadd.f32 %v1364_v9, %v1003_v13 }
 0x328   : > { %v1044_v20 = vadd.f32 %v1364_v9, %v1028_v18 }
 0x329   : > { %v1038_v19 = vadd.f32 %v1036_v8, %v1034_v17 }
 0x32a   : > { %v1048_v22 = vadd.f32 %v1046_v21, %v1044_v20 }
 0x32b   : > { %1040 = vrot.lane.b32.xlu2 %v1038_v19, %s1401_s24 }
 0x333   : > { %1050 = vrot.lane.b32.xlu2 %v1048_v22, %s1401_s24 }
 0x385   : > { %v1041_v23 = vpop.permute.xlu2 %1040 }
 0x386   : > { %1043 = vst.msk [vmem:[#allocation2 + $0x2] sm:$0xff] %vm345_vm3, %v1041_v23 }
 0x38b   :  { %363 = sbr.rel (!%p361_p0) target bundleno = 318 (0x13e), region = 72 }
 0x38d   : > { %v1051_v24 = vpop.permute.xlu2 %1050  ;;  %v1054_v25 = vld [vmem:[#allocation2 + $0x2] sm:$0xff] (%p361_p0) }
 0x38e   : > { %1053 = vst.msk [vmem:[#allocation2 + $0x12] sm:$0xff] %vm345_vm3, %v1051_v24  ;;  %1056 = vrot.lane.b32.xlu0 (%p361_p0), %v1054_v25, %s1403_s26 }
 0x395   :  { %v1061_v26 = vld [vmem:[#allocation2 + $0x12] sm:$0xff] }
 0x396   :  { %1063 = vrot.lane.b32.xlu0 %v1061_v26, %s1403_s26 }
 0x400   :  { %v1057_v27 = vpop.permute.xlu0 %1056 }
 0x401   :  { %1060 = vst.msk [vmem:[#allocation3] sm:$0xff] %vm1059_vm4, %v1057_v27 }
 0x408   :  { %v1064_v12 = vpop.permute.xlu0 %1063 }
 0x409   :  { %1067 = vst.msk [vmem:[#allocation3 + $0x8] sm:$0xff] %vm1059_vm4, %v1064_v12 }
 0x40a   :  { %1080 = dma.vmem_to_hbm [thread:$0]  %s1073_s28, 256, %s1075_s6, [#allocation4], %s1405_s7, %s1405_s7, %s1406_s8  }
 0x40b   :  { %1393 = dma.done.wait [#allocation4], 256  }
 0x40c   :  { %1394 = vsyncadd [#allocation4], 4294967040 }
 0x40d   :  { %1085 = vsyncpa [#allocation4], 1 }

</bundles_post_ra>
